<compile_context>
chip_gen: v5e
topology: v5e:2x2
jax: 0.10.0
libtpu: 0.0.40
codegen_flags: <defaults>
</compile_context>

<pallas_src>
import functools
import math

import jax
import jax.numpy as jnp
from jax import lax
from jax.experimental import pallas as pl
from jax.experimental.pallas import tpu as pltpu


def _lightgcn_kernel(a_ref, dk_ref, di_ref, e0_ref, out_ref,
                     cur_ref, mm_ref, abf_ref, esc_ref,
                     *, tm, tk, n_pad, inv_total):
    """One grid step of (layer l, row tile i, K tile k).

    a_ref   : [tm, tk]     int8  raw adjacency counts tile (streamed from HBM)
    dk_ref  : [tk, 1]      f32   deg^{-1/2} rows for this K tile
    di_ref  : [tm, 1]      f32   deg^{-1/2} rows for this row tile
    e0_ref  : [n_pad, d]   bf16  initial embeddings, raw HBM ref (pl.ANY)
    out_ref : [n_pad, d]   f32   resident layer sum -> final mean
    cur_ref : [2*n_pad, d] bf16  ping-pong E_{l-1} / E_l       (VMEM scratch)
    mm_ref  : [tm, d]      f32   K-loop matmul accumulator     (VMEM scratch)
    abf_ref : [tm, tk]     bf16  staged bf16 copy of the A tile
    esc_ref : [tk, d]      bf16  staged D^{-1/2}-scaled E tile
    """
    layer = pl.program_id(0)
    i = pl.program_id(1)
    k = pl.program_id(2)
    num_layers = pl.num_programs(0)
    num_k = pl.num_programs(2)

    # ---- one-time init: DMA E_0 into ping slot 0 --------------------------
    @pl.when((layer == 0) & (i == 0) & (k == 0))
    def _init():
        pltpu.sync_copy(e0_ref, cur_ref.at[pl.ds(0, n_pad), :])

    # Ping-pong slots selected by layer parity (flattened into a 2N buffer).
    read_base = lax.rem(layer, 2) * n_pad       # slot holding E_{l-1}
    write_base = n_pad - read_base              # slot receiving E_l

    # ---- start of the K loop: zero the per-row-tile matmul accumulator ----
    @pl.when(k == 0)
    def _zero():
        mm_ref[...] = jnp.zeros_like(mm_ref)

    # ---- stage MXU operands ------------------------------------------------
    # int8 adjacency -> bf16 (VPU, hidden under the A-tile DMA)
    abf_ref[...] = a_ref[...].astype(jnp.float32).astype(jnp.bfloat16)
    # column scaling: D^{-1/2} E_{l-1} rows for this K tile
    k_off = pl.multiple_of(read_base + k * tk, tk)
    esc_ref[...] = (cur_ref[pl.ds(k_off, tk), :]
                    * dk_ref[...].astype(jnp.bfloat16))

    # ---- MXU: [tm, tk] bf16 x [tk, d] bf16 -> f32 accumulation -------------
    mm_ref[...] += jnp.dot(abf_ref[...], esc_ref[...],
                           preferred_element_type=jnp.float32)

    # ---- end of the K loop: finish E_l rows, commit, fold into the mean ----
    @pl.when(k == num_k - 1)
    def _commit():
        new_rows = mm_ref[...] * di_ref[...]            # f32 [tm, d] = E_l rows
        w_off = pl.multiple_of(write_base + i * tm, tm)
        cur_ref[pl.ds(w_off, tm), :] = new_rows.astype(cur_ref.dtype)

        r_off = pl.multiple_of(i * tm, tm)

        @pl.when(layer == 0)
        def _seed():
            # slot 0 still holds E_0 during layer 0: seed the sum per row tile
            e0_rows = cur_ref[pl.ds(r_off, tm), :].astype(jnp.float32)
            out_ref[pl.ds(r_off, tm), :] = e0_rows + new_rows

        @pl.when(layer > 0)
        def _accumulate():
            out_ref[pl.ds(r_off, tm), :] += new_rows

        @pl.when(layer == num_layers - 1)
        def _mean():
            out_ref[pl.ds(r_off, tm), :] *= inv_total


def _physical_vmem_bytes():
    try:
        info = pltpu.get_tpu_info()
        return int(getattr(info, "vmem_capacity_bytes", 64 << 20))
    except Exception:
        return 64 << 20   # conservative fallback (v7x per-TensorCore)


def lightgcn_propagate(adj_counts, deg_inv_sqrt, embeddings, num_layers, *,
                       tm=1024, tk=1024):
    """mean([E_0, A_hat@E_0, A_hat^2@E_0, ...]) with A_hat = D^{-1/2} A D^{-1/2}.

    adj_counts   : [n, n] integer adjacency counts (coalesced duplicate edges,
                   must fit int8, i.e. <= 127 duplicates per pair).
    deg_inv_sqrt : [n]    deg^{-1/2} with 0 for isolated nodes.
    embeddings   : [n, d] initial embedding table (d multiple of 128).
    """
    n, d = embeddings.shape
    assert adj_counts.shape == (n, n)
    assert deg_inv_sqrt.shape == (n,)
    if num_layers <= 0:
        return embeddings.astype(jnp.float32)
    if d % 128 != 0:
        # TODO(synk): support non-128-multiple embedding dims via lane padding.
        raise ValueError("embedding_dim must be a multiple of 128")

    block = math.lcm(tm, tk)
    n_pad = ((n + block - 1) // block) * block

    # Zero padding keeps the math identical for the first n rows
    # (padded rows/cols of A and padded deg^{-1/2} entries are zero).
    a_i8 = jnp.zeros((n_pad, n_pad), jnp.int8).at[:n, :n].set(
        adj_counts.astype(jnp.int8))
    e0_bf = jnp.zeros((n_pad, d), jnp.bfloat16).at[:n, :].set(
        embeddings.astype(jnp.bfloat16))
    dinv = jnp.zeros((n_pad, 1), jnp.float32).at[:n, 0].set(
        deg_inv_sqrt.astype(jnp.float32))

    grid = (num_layers, n_pad // tm, n_pad // tk)

    # Exact VMEM budget (no double counting), generation-aware limit.
    vmem_bytes = (
        2 * tm * tk * 1            # int8 A tile, double-buffered
        + tm * tk * 2              # staged bf16 A tile
        + tk * d * 2               # staged scaled E tile
        + 2 * n_pad * d * 2        # ping-pong E_{l-1}/E_l, bf16
        + n_pad * d * 4            # resident output block (layer mean), f32
        + tm * d * 4               # K-loop accumulator, f32
        + 2 * (tm + tk) * 128 * 4  # deg^{-1/2} tiles (lane padded), dbl-buffered
    )
    cap = _physical_vmem_bytes() - (8 << 20)   # leave compiler headroom
    if vmem_bytes > cap:
        raise ValueError(
            f"VMEM budget {vmem_bytes >> 20} MiB exceeds {cap >> 20} MiB; "
            "reduce tm/tk.  TODO(synk): stream E from HBM for very large N.")
    vmem_limit = int(min(max(2 * vmem_bytes + (8 << 20), 32 << 20), cap))

    kernel = functools.partial(
        _lightgcn_kernel, tm=tm, tk=tk, n_pad=n_pad,
        inv_total=1.0 / (num_layers + 1.0))

    out = pl.pallas_call(
        kernel,
        out_shape=jax.ShapeDtypeStruct((n_pad, d), jnp.float32),
        grid=grid,
        in_specs=[
            pl.BlockSpec((tm, tk), lambda l, i, k: (i, k)),   # int8 A tiles
            pl.BlockSpec((tk, 1), lambda l, i, k: (k, 0)),    # deg^-1/2 (K side)
            pl.BlockSpec((tm, 1), lambda l, i, k: (i, 0)),    # deg^-1/2 (row side)
            pl.BlockSpec(memory_space=pl.ANY),                # E_0 (HBM, DMA'd once)
        ],
        out_specs=pl.BlockSpec((n_pad, d), lambda l, i, k: (0, 0)),
        scratch_shapes=[
            pltpu.VMEM((2 * n_pad, d), jnp.bfloat16),   # ping-pong E layers
            pltpu.VMEM((tm, d), jnp.float32),           # K-loop accumulator
            pltpu.VMEM((tm, tk), jnp.bfloat16),         # staged bf16 A tile
            pltpu.VMEM((tk, d), jnp.bfloat16),          # staged scaled E tile
        ],
        compiler_params=pltpu.CompilerParams(
            dimension_semantics=("arbitrary", "arbitrary", "arbitrary"),
            vmem_limit_bytes=vmem_limit,
        ),
    )(a_i8, dinv, dinv, e0_bf)
    return out[:n]


def build_adjacency(edge_index, num_nodes):
    """Raw adjacency counts + D^{-1/2}: factored form of build_normalized_adj.

    A_hat = D^{-1/2} A D^{-1/2};  torch.sparse_coo_tensor(...).coalesce() sums
    duplicate entries -> scatter-add of ones.  Counts must fit int8.
    """
    row, col = edge_index
    counts = jnp.zeros((num_nodes, num_nodes), jnp.int32).at[row, col].add(1)
    deg = counts.sum(axis=1).astype(jnp.float32)
    deg_inv_sqrt = jnp.power(deg, -0.5)
    deg_inv_sqrt = jnp.where(jnp.isinf(deg_inv_sqrt), 0.0, deg_inv_sqrt)
    return counts, deg_inv_sqrt


def lightgcn_forward(adj_counts, deg_inv_sqrt, embedding_weight, num_layers,
                     num_users, num_st_nodes, *, tm=1024, tk=1024):
    final = lightgcn_propagate(adj_counts, deg_inv_sqrt, embedding_weight,
                               num_layers, tm=tm, tk=tk)
    user_emb = final[:num_users]
    st_emb = final[num_users:num_users + num_st_nodes]
    intent_emb = final[num_users + num_st_nodes:]
    return user_emb, st_emb, intent_emb


def xavier_uniform(key, shape):
    fan_in, fan_out = shape[0], shape[1]
    bound = jnp.sqrt(6.0 / (fan_in + fan_out))
    return jax.random.uniform(
        key, shape, dtype=jnp.float32, minval=-bound, maxval=bound)


if __name__ == "__main__":
    # Small synthetic configuration.
    num_users = 256
    num_st_nodes = 64
    num_intents = 64
    embedding_dim = 128
    num_layers = 3
    total_num_nodes = num_users + num_st_nodes + num_intents  # 384

    key = jax.random.PRNGKey(0)
    k_emb, k_src, k_dst = jax.random.split(key, 3)

    embedding_weight = xavier_uniform(k_emb, (total_num_nodes, embedding_dim))

    # Deterministic synthetic edges, symmetrized like an interaction graph.
    num_edges = 2048
    src = jax.random.randint(k_src, (num_edges,), 0, total_num_nodes)
    dst = jax.random.randint(k_dst, (num_edges,), 0, total_num_nodes)
    row = jnp.concatenate([src, dst])
    col = jnp.concatenate([dst, src])
    adj_counts, deg_inv_sqrt = build_adjacency((row, col), total_num_nodes)

    # Run 1: small tiles exercise row tiling, K tiling and the layer
    # ping-pong (n_pad=512 with 256x128 tiles -> grid (3, 2, 4)).
    out_small = lightgcn_forward(adj_counts, deg_inv_sqrt, embedding_weight,
                                 num_layers, num_users, num_st_nodes,
                                 tm=256, tk=128)
    # Run 2: default 1024-class tiles (the near-roofline configuration).
    out_big = lightgcn_forward(adj_counts, deg_inv_sqrt, embedding_weight,
                               num_layers, num_users, num_st_nodes)
    jax.block_until_ready((out_small, out_big))

    for ue, se, ie in (out_small, out_big):
        assert ue.shape == (num_users, embedding_dim)
        assert se.shape == (num_st_nodes, embedding_dim)
        assert ie.shape == (num_intents, embedding_dim)

    # --- References ----------------------------------------------------------
    dinv = deg_inv_sqrt
    counts_f = adj_counts.astype(jnp.float32)
    a_hat = dinv[:, None] * counts_f * dinv[None, :]

    def bf(x):
        return x.astype(jnp.bfloat16).astype(jnp.float32)

    # Reference 1: emulates the kernel arithmetic (bf16 MXU operands, exact
    # integer A, f32 accumulation, f32 row scaling) -> tight tolerance.
    dinv_bf = bf(dinv)[:, None]
    cur = bf(embedding_weight)
    acc = cur
    for _ in range(num_layers):
        scaled = bf(cur * dinv_bf)
        nxt = (counts_f @ scaled) * dinv[:, None]
        acc = acc + nxt
        cur = bf(nxt)
    ref_bf = acc / (num_layers + 1.0)

    # Reference 2: pure f32 semantics of the original PyTorch module.
    e = embedding_weight
    acc32 = e
    for _ in range(num_layers):
        e = a_hat @ e
        acc32 = acc32 + e
    ref32 = acc32 / (num_layers + 1.0)

    for ue, se, ie in (out_small, out_big):
        got = jnp.concatenate([ue, se, ie], axis=0)
        assert jnp.allclose(got, ref_bf, atol=1e-2, rtol=5e-2), \
            float(jnp.max(jnp.abs(got - ref_bf)))
        assert jnp.allclose(got, ref32, atol=3e-2, rtol=1e-1), \
            float(jnp.max(jnp.abs(got - ref32)))

    print("KERNEL_OK")
</pallas_src>

<mosaic_0001>
module attributes {stable_mosaic.version = 11 : i64} {
  func.func @_lightgcn_kernel(%arg0: i32, %arg1: i32, %arg2: i32, %arg3: memref<256x128xi8, #tpu.memory_space<vmem>>, %arg4: memref<128x1xf32, #tpu.memory_space<vmem>>, %arg5: memref<256x1xf32, #tpu.memory_space<vmem>>, %arg6: memref<512x128xbf16, #tpu.memory_space<any>>, %arg7: memref<512x128xf32, #tpu.memory_space<vmem>>, %arg8: memref<1024x128xbf16, #tpu.memory_space<vmem>>, %arg9: memref<256x128xf32, #tpu.memory_space<vmem>>, %arg10: memref<256x128xbf16, #tpu.memory_space<vmem>>, %arg11: memref<128x128xbf16, #tpu.memory_space<vmem>>) attributes {dimension_semantics = [#tpu.dimension_semantics<arbitrary>, #tpu.dimension_semantics<arbitrary>, #tpu.dimension_semantics<arbitrary>], iteration_bounds = array<i64: 3, 2, 4>, scalar_prefetch = 0 : i64, scratch_operands = 4 : i64, tpu.core_type = #tpu.core_type<tc>, window_params = [{transform_indices = @transform_0, window_bounds = array<i64: 256, 128>}, {transform_indices = @transform_1, window_bounds = array<i64: 128, 1>}, {transform_indices = @transform_2, window_bounds = array<i64: 256, 1>}, {}, {pipeline_mode = #tpu.pipeline_mode<synchronous>, transform_indices = @transform_4, window_bounds = array<i64: 512, 128>}]} {
    %c0_i32 = arith.constant 0 : i32
    %0 = arith.cmpi eq, %arg0, %c0_i32 : i32
    %c0_i32_0 = arith.constant 0 : i32
    %1 = arith.cmpi eq, %arg1, %c0_i32_0 : i32
    %2 = arith.andi %0, %1 : i1
    %c0_i32_1 = arith.constant 0 : i32
    %3 = arith.cmpi eq, %arg2, %c0_i32_1 : i32
    %4 = arith.andi %2, %3 : i1
    %5 = arith.extui %4 : i1 to i32
    %c0_i32_2 = arith.constant 0 : i32
    %6 = arith.cmpi ne, %5, %c0_i32_2 : i32
    scf.if %6 {
      "tpu.region"() ({
        %36 = tpu.sem_alloc : memref<!tpu.dma_semaphore, #tpu.memory_space<semaphore_mem>>
        %c0_i32_23 = arith.constant 0 : i32
        %c0_i32_24 = arith.constant 0 : i32
        %37 = tpu.memref_slice %arg8[%c0_i32_23, %c0_i32_24] : memref<1024x128xbf16, #tpu.memory_space<vmem>> -> memref<512x128xbf16, #tpu.memory_space<vmem>>
        tpu.enqueue_dma source(%arg6 : memref<512x128xbf16, #tpu.memory_space<any>>) target(%37 : memref<512x128xbf16, #tpu.memory_space<vmem>>) target_semaphore(%36 : memref<!tpu.dma_semaphore, #tpu.memory_space<semaphore_mem>>)
        %c0_i32_25 = arith.constant 0 : i32
        %c0_i32_26 = arith.constant 0 : i32
        %38 = tpu.memref_slice %arg8[%c0_i32_25, %c0_i32_26] : memref<1024x128xbf16, #tpu.memory_space<vmem>> -> memref<512x128xbf16, #tpu.memory_space<vmem>>
        tpu.wait_dma2 semaphore(%36 : memref<!tpu.dma_semaphore, #tpu.memory_space<semaphore_mem>>) src(%arg6 : memref<512x128xbf16, #tpu.memory_space<any>>) dst(%38 : memref<512x128xbf16, #tpu.memory_space<vmem>>)
        tpu.yield
      }) : () -> ()
    } else {
    }
    %c2_i32 = arith.constant 2 : i32
    %7 = arith.remsi %arg0, %c2_i32 : i32
    %c512_i32 = arith.constant 512 : i32
    %8 = arith.muli %7, %c512_i32 : i32
    %c512_i32_3 = arith.constant 512 : i32
    %9 = arith.subi %c512_i32_3, %8 : i32
    %c0_i32_4 = arith.constant 0 : i32
    %10 = arith.cmpi eq, %arg2, %c0_i32_4 : i32
    %11 = arith.extui %10 : i1 to i32
    %c0_i32_5 = arith.constant 0 : i32
    %12 = arith.cmpi ne, %11, %c0_i32_5 : i32
    scf.if %12 {
      %cst_23 = arith.constant 0.000000e+00 : f32
      %36 = vector.broadcast %cst_23 : f32 to vector<256x128xf32>
      %c0_24 = arith.constant 0 : index
      %c0_25 = arith.constant 0 : index
      %37 = vector.load %arg9[%c0_24, %c0_25] : memref<256x128xf32, #tpu.memory_space<vmem>>, vector<256x128xf32>
      tpu.vector_store %arg9[%c0_24, %c0_25], %36 {strides = array<i32>} : memref<256x128xf32, #tpu.memory_space<vmem>>, vector<256x128xf32>,
    } else {
    }
    %c0 = arith.constant 0 : index
    %c0_6 = arith.constant 0 : index
    %13 = vector.load %arg3[%c0, %c0_6] : memref<256x128xi8, #tpu.memory_space<vmem>>, vector<256x128xi8>
    %14 = arith.sitofp %13 : vector<256x128xi8> to vector<256x128xf32>
    %15 = arith.truncf %14 : vector<256x128xf32> to vector<256x128xbf16>
    %c0_7 = arith.constant 0 : index
    %c0_8 = arith.constant 0 : index
    %16 = vector.load %arg10[%c0_7, %c0_8] : memref<256x128xbf16, #tpu.memory_space<vmem>>, vector<256x128xbf16>
    tpu.vector_store %arg10[%c0_7, %c0_8], %15 {strides = array<i32>} : memref<256x128xbf16, #tpu.memory_space<vmem>>, vector<256x128xbf16>,
    %c128_i32 = arith.constant 128 : i32
    %17 = arith.muli %arg2, %c128_i32 : i32
    %18 = arith.addi %8, %17 : i32
    %19 = tpu.assume_multiple %18, 128 : i32
    %20 = arith.index_cast %19 : i32 to index
    %c0_9 = arith.constant 0 : index
    %21 = vector.load %arg8[%20, %c0_9] : memref<1024x128xbf16, #tpu.memory_space<vmem>>, vector<128x128xbf16>
    %c0_10 = arith.constant 0 : index
    %c0_11 = arith.constant 0 : index
    %22 = vector.load %arg4[%c0_10, %c0_11] : memref<128x1xf32, #tpu.memory_space<vmem>>, vector<128x1xf32>
    %23 = arith.truncf %22 : vector<128x1xf32> to vector<128x1xbf16>
    %24 = vector.broadcast %23 : vector<128x1xbf16> to vector<128x128xbf16>
    %25 = arith.mulf %21, %24 : vector<128x128xbf16>
    %c0_12 = arith.constant 0 : index
    %c0_13 = arith.constant 0 : index
    %26 = vector.load %arg11[%c0_12, %c0_13] : memref<128x128xbf16, #tpu.memory_space<vmem>>, vector<128x128xbf16>
    tpu.vector_store %arg11[%c0_12, %c0_13], %25 {strides = array<i32>} : memref<128x128xbf16, #tpu.memory_space<vmem>>, vector<128x128xbf16>,
    %c0_14 = arith.constant 0 : index
    %c0_15 = arith.constant 0 : index
    %27 = vector.load %arg9[%c0_14, %c0_15] : memref<256x128xf32, #tpu.memory_space<vmem>>, vector<256x128xf32>
    %c0_16 = arith.constant 0 : index
    %c0_17 = arith.constant 0 : index
    %28 = vector.load %arg10[%c0_16, %c0_17] : memref<256x128xbf16, #tpu.memory_space<vmem>>, vector<256x128xbf16>
    %c0_18 = arith.constant 0 : index
    %c0_19 = arith.constant 0 : index
    %29 = vector.load %arg11[%c0_18, %c0_19] : memref<128x128xbf16, #tpu.memory_space<vmem>>, vector<128x128xbf16>
    %cst = arith.constant dense<0.000000e+00> : vector<256x128xf32>
    %30 = tpu.matmul %28, %29, %cst {dimension_numbers = #tpu.dot_dimension_numbers<[1], [0], [0], [1], [0, 0, 1, 1], [], []>} : vector<256x128xbf16>, vector<128x128xbf16>, vector<256x128xf32> -> vector<256x128xf32>
    %31 = arith.addf %27, %30 : vector<256x128xf32>
    %c0_20 = arith.constant 0 : index
    %c0_21 = arith.constant 0 : index
    %32 = vector.load %arg9[%c0_20, %c0_21] : memref<256x128xf32, #tpu.memory_space<vmem>>, vector<256x128xf32>
    tpu.vector_store %arg9[%c0_20, %c0_21], %31 {strides = array<i32>} : memref<256x128xf32, #tpu.memory_space<vmem>>, vector<256x128xf32>,
    %c3_i32 = arith.constant 3 : i32
    %33 = arith.cmpi eq, %arg2, %c3_i32 : i32
    %34 = arith.extui %33 : i1 to i32
    %c0_i32_22 = arith.constant 0 : i32
    %35 = arith.cmpi ne, %34, %c0_i32_22 : i32
    scf.if %35 {
      %c0_23 = arith.constant 0 : index
      %c0_24 = arith.constant 0 : index
      %36 = vector.load %arg9[%c0_23, %c0_24] : memref<256x128xf32, #tpu.memory_space<vmem>>, vector<256x128xf32>
      %c0_25 = arith.constant 0 : index
      %c0_26 = arith.constant 0 : index
      %37 = vector.load %arg5[%c0_25, %c0_26] : memref<256x1xf32, #tpu.memory_space<vmem>>, vector<256x1xf32>
      %38 = vector.broadcast %37 : vector<256x1xf32> to vector<256x128xf32>
      %39 = arith.mulf %36, %38 : vector<256x128xf32>
      %c256_i32 = arith.constant 256 : i32
      %40 = arith.muli %arg1, %c256_i32 : i32
      %41 = arith.addi %9, %40 : i32
      %42 = tpu.assume_multiple %41, 256 : i32
      %43 = arith.truncf %39 : vector<256x128xf32> to vector<256x128xbf16>
      %44 = arith.index_cast %42 : i32 to index
      %c0_27 = arith.constant 0 : index
      %45 = vector.load %arg8[%44, %c0_27] : memref<1024x128xbf16, #tpu.memory_space<vmem>>, vector<256x128xbf16>
      tpu.vector_store %arg8[%44, %c0_27], %43 {strides = array<i32>} : memref<1024x128xbf16, #tpu.memory_space<vmem>>, vector<256x128xbf16>,
      %c256_i32_28 = arith.constant 256 : i32
      %46 = arith.muli %arg1, %c256_i32_28 : i32
      %47 = tpu.assume_multiple %46, 256 : i32
      %c0_i32_29 = arith.constant 0 : i32
      %48 = arith.cmpi eq, %arg0, %c0_i32_29 : i32
      %49 = arith.extui %48 : i1 to i32
      %c0_i32_30 = arith.constant 0 : i32
      %50 = arith.cmpi ne, %49, %c0_i32_30 : i32
      scf.if %50 {
        %57 = arith.index_cast %47 : i32 to index
        %c0_35 = arith.constant 0 : index
        %58 = vector.load %arg8[%57, %c0_35] : memref<1024x128xbf16, #tpu.memory_space<vmem>>, vector<256x128xbf16>
        %59 = arith.extf %58 : vector<256x128xbf16> to vector<256x128xf32>
        %60 = arith.addf %59, %39 : vector<256x128xf32>
        %61 = arith.index_cast %47 : i32 to index
        %c0_36 = arith.constant 0 : index
        %62 = vector.load %arg7[%61, %c0_36] : memref<512x128xf32, #tpu.memory_space<vmem>>, vector<256x128xf32>
        tpu.vector_store %arg7[%61, %c0_36], %60 {strides = array<i32>} : memref<512x128xf32, #tpu.memory_space<vmem>>, vector<256x128xf32>,
      } else {
      }
      %c0_i32_31 = arith.constant 0 : i32
      %51 = arith.cmpi sgt, %arg0, %c0_i32_31 : i32
      %52 = arith.extui %51 : i1 to i32
      %c0_i32_32 = arith.constant 0 : i32
      %53 = arith.cmpi ne, %52, %c0_i32_32 : i32
      scf.if %53 {
        %57 = arith.index_cast %47 : i32 to index
        %c0_35 = arith.constant 0 : index
        %58 = vector.load %arg7[%57, %c0_35] : memref<512x128xf32, #tpu.memory_space<vmem>>, vector<256x128xf32>
        %59 = arith.addf %58, %39 : vector<256x128xf32>
        %60 = arith.index_cast %47 : i32 to index
        %c0_36 = arith.constant 0 : index
        %61 = vector.load %arg7[%60, %c0_36] : memref<512x128xf32, #tpu.memory_space<vmem>>, vector<256x128xf32>
        tpu.vector_store %arg7[%60, %c0_36], %59 {strides = array<i32>} : memref<512x128xf32, #tpu.memory_space<vmem>>, vector<256x128xf32>,
      } else {
      }
      %c2_i32_33 = arith.constant 2 : i32
      %54 = arith.cmpi eq, %arg0, %c2_i32_33 : i32
      %55 = arith.extui %54 : i1 to i32
      %c0_i32_34 = arith.constant 0 : i32
      %56 = arith.cmpi ne, %55, %c0_i32_34 : i32
      scf.if %56 {
        %57 = arith.index_cast %47 : i32 to index
        %c0_35 = arith.constant 0 : index
        %58 = vector.load %arg7[%57, %c0_35] : memref<512x128xf32, #tpu.memory_space<vmem>>, vector<256x128xf32>
        %cst_36 = arith.constant 2.500000e-01 : f32
        %59 = vector.broadcast %cst_36 : f32 to vector<256x128xf32>
        %60 = arith.mulf %58, %59 : vector<256x128xf32>
        %61 = arith.index_cast %47 : i32 to index
        %c0_37 = arith.constant 0 : index
        %62 = vector.load %arg7[%61, %c0_37] : memref<512x128xf32, #tpu.memory_space<vmem>>, vector<256x128xf32>
        tpu.vector_store %arg7[%61, %c0_37], %60 {strides = array<i32>} : memref<512x128xf32, #tpu.memory_space<vmem>>, vector<256x128xf32>,
      } else {
      }
    } else {
    }
    return
  }
  func.func @transform_0(%arg0: i32, %arg1: i32, %arg2: i32) -> (i32, i32) {
    %c0_i32 = arith.constant 0 : i32
    return %arg1, %arg2 : i32, i32
  }
  func.func @transform_1(%arg0: i32, %arg1: i32, %arg2: i32) -> (i32, i32) {
    %c0_i32 = arith.constant 0 : i32
    %c0_i32_0 = arith.constant 0 : i32
    return %arg2, %c0_i32 : i32, i32
  }
  func.func @transform_2(%arg0: i32, %arg1: i32, %arg2: i32) -> (i32, i32) {
    %c0_i32 = arith.constant 0 : i32
    %c0_i32_0 = arith.constant 0 : i32
    return %arg1, %c0_i32 : i32, i32
  }
  func.func @transform_4(%arg0: i32, %arg1: i32, %arg2: i32) -> (i32, i32) {
    %c0_i32 = arith.constant 0 : i32
    %c0_i32_0 = arith.constant 0 : i32
    %c0_i32_1 = arith.constant 0 : i32
    return %c0_i32, %c0_i32_0 : i32, i32
  }
}

</mosaic_0001>

<bundles_post_ra>
// kernel: tpu_custom_call.1
= control target key start
LH: loop header
LB: loop body
LE: loop exit
PB: predicated region body
PF: predicated region fallthrough
CT: control target
= control target key end

     0   :  { %9 = vsyncpa [#allocation8], 0  ;;  %s2759_s15 = smov 0   ;;  %s2761_s16 = smov 0   ;;  %s3479_s0 = inlined_call_operand.vmem [shape: s8[512,512], index: 0, kind: input, shape index: {}]   ;;  %s3480_s1 = inlined_call_operand.vmem [shape: f32[512,1], index: 1, kind: input, shape index: {}]   ;;  %s3481_s2 = inlined_call_operand.vmem [shape: f32[512,1], index: 2, kind: input, shape index: {}]   ;;  %s3482_s3 = inlined_call_operand.vmem [shape: bf16[512,128], index: 3, kind: input, shape index: {}]   ;;  %s3483_s4 = inlined_call_operand.hbm [shape: f32[512,128], index: 4, kind: output, shape index: {}]  }
   0x1   :  { %s2763_s17 = smov 0   ;;  %s2765_s18 = smov 0  }
   0x2   :  { %s2767_s19 = smov 0   ;;  %s2769_s20 = smov 0  }
   0x3   :  { %s2771_s21 = smov 0   ;;  %s2773_s22 = smov 0  }
   0x4   :  { %s2775_s23 = smov 0  }
   0x5 LB: > { %s2001_s24 = sadd.s32 4294967295, %s2725_s23   ;;  %s27_s25 = sadd.s32 1, %s2713_s20  ;;  %s2725_s23 = sphi %s2775_s23, %s15_s23   ;;  %s2721_s22 = sphi %s2773_s22, %s3491_s22   ;;  %s2717_s21 = sphi %s2771_s21, %s3490_s21   ;;  %s2713_s20 = sphi %s2769_s20, %s3489_s20   ;;  %s2709_s19 = sphi %s2767_s19, %s3488_s19   ;;  %s2705_s18 = sphi %s2765_s18, %s3487_s18   ;;  %s2701_s17 = sphi %s2763_s17, %s3486_s17   ;;  %s2697_s16 = sphi %s2761_s16, %s3485_s16   ;;  %s2693_s15 = sphi %s2759_s15, %s3484_s15  }
   0x6   : > { %p28_p0 = scmp.ge.s32.totalorder %s27_s25, 4  ;;  %s30_s26 = sadd.s32 1, %s2717_s21 }
   0x7   : > { %s34_s27 = sadd.s32 1, %s2721_s22  ;;  %p50_p1 = scmp.ne.s32.totalorder %s2697_s16, %s2693_s15 }
   0x8   : > { %s3493_s25 = smov (%p28_p0, %s27_s25), 0  ;;  %s3495_s26 = smov (!%p28_p0, %s30_s26), %s2717_s21 }
   0x9   : > { %p32_p2 = scmp.ge.s32.totalorder %s3495_s26, 2  ;;  %p51_p3 = scmp.eq.s32.totalorder %s2725_s23, 0 }
   0xa   : > { %s39_s28 = ssub.s32 %s2713_s20, %s3493_s25  ;;  %s43_s29 = sadd.s32 1, %s2697_s16 }
   0xb   : > { %s3497_s26 = smov (%p32_p2, %s3495_s26), 0  ;;  %s3499_s27 = smov (!%p32_p2, %s34_s27), %s2721_s22 }
   0xc   : > { %s38_s30 = ssub.s32 %s2717_s21, %s3497_s26  ;;  %p52_p4 = por %p51_p3, %p50_p1 }
   0xd   : > { %p36_p5 = scmp.ge.s32.totalorder %s3499_s27, 3  ;;  %s40_s5 = sor.u32 %s39_s28, %s38_s30 }
   0xe   : > { %p41_p6 = scmp.eq.s32.totalorder %s40_s5, 0  ;;  %p2003_p7 = scmp.ge.s32.totalorder %s2725_s23, 24 }
   0xf   : > { %s3501_s27 = smov (%p36_p5, %s3499_s27), 0 }
  0x10   : > { %s2825_s6 = scalar_select %p41_p6, %s2697_s16, %s43_s29  }
  0x11   : > { %149 = sbr.rel (%p2003_p7) target bundleno = 36 (0x24), region = 16 }
  0x16   : > { %152 = sbr.rel (!%p52_p4) target bundleno = 36 (0x24), region = 20  ;;  %s154_s7 = sand.u32 (%p52_p4), 1, %s2697_s16  }
  0x17   : > { %s2126_s8 = sshll.u32 (%p52_p4), %s2717_s21, 5  ;;  %s2004_s9 = sshll.u32 (%p52_p4), %s154_s7, 6 }
  0x18   : > { %s159_s10 = sadd.s32 (%p52_p4), %s2713_s20, %s2126_s8  ;;  %s156_s28 = scalar_lea.vmem (%p52_p4), [#allocation6], %s2004_s9 }
  0x19   : > { %s2007_s11 = sshll.u32 (%p52_p4), %s159_s10, 3 }
  0x1a   : > { %s161_s14 = scalar_lea.vmem (%p52_p4), %s3479_s0, %s2007_s11 }
  0x1b   : > { %v204_v0 = vld [vmem:[%s161_s14] sm:$0xff] }
  0x1c   : > { %v206_v1 = vld [vmem:[%s161_s14 + $0x20] sm:$0xff]  ;;  %205 = vst [vmem:[%s156_s28] sm:$0xff] %v204_v0 }
  0x1d   : > { %v208_v2 = vld [vmem:[%s161_s14 + $0x40] sm:$0xff]  ;;  %207 = vst [vmem:[%s156_s28 + $0x8] sm:$0xff] %v206_v1 }
  0x1e   : > { %v210_v3 = vld [vmem:[%s161_s14 + $0x60] sm:$0xff]  ;;  %209 = vst [vmem:[%s156_s28 + $0x10] sm:$0xff] %v208_v2 }
  0x1f   : > { %v212_v4 = vld [vmem:[%s161_s14 + $0x80] sm:$0xff]  ;;  %211 = vst [vmem:[%s156_s28 + $0x18] sm:$0xff] %v210_v3 }
  0x20   : > { %v214_v5 = vld [vmem:[%s161_s14 + $0xa0] sm:$0xff]  ;;  %213 = vst [vmem:[%s156_s28 + $0x20] sm:$0xff] %v212_v4 }
  0x21   : > { %v216_v6 = vld [vmem:[%s161_s14 + $0xc0] sm:$0xff]  ;;  %215 = vst [vmem:[%s156_s28 + $0x28] sm:$0xff] %v214_v5 }
  0x22   : > { %v218_v7 = vld [vmem:[%s161_s14 + $0xe0] sm:$0xff]  ;;  %217 = vst [vmem:[%s156_s28 + $0x30] sm:$0xff] %v216_v6 }
  0x23   : > { %219 = vst [vmem:[%s156_s28 + $0x38] sm:$0xff] %v218_v7 }
  0x24 PF: > { %p2008_p8 = scmp.ge.s32.totalorder %s2725_s23, 1  ;;  %p242_p9 = scmp.lt.s32.totalorder %s2725_s23, 25 }
  0x26   : > { %p243_p10 = pnand %p2008_p8, %p242_p9 }
  0x27   : > { %s249_s29 = sand.u32 (!%p243_p10), 1, %s2693_s15   ;;  %s2010_s30 = sshll.u32 (!%p243_p10), %s2701_s17, 4 }
  0x28   : > { %246 = sbr.rel (%p243_p10) target bundleno = 840 (0x348), region = 66  ;;  %s2009_s5 = sshll.u32 (!%p243_p10), %s249_s29, 6 }
  0x29   : > { %p279_p11 = scmp.lt.s32.totalorder (!%p243_p10), %s2010_s30, 63  ;;  %s2012_s7 = sshll.u32 (!%p243_p10), %s2705_s18, 5 }
  0x2a   : > { %p285_p12 = scmp.lt.s32.totalorder (!%p243_p10), %s2012_s7, 63  ;;  %p290_p13 = scmp.eq.s32.totalorder (!%p243_p10), %s2709_s19, 0 }
  0x2b   : > { %p291_p0 = scmp.eq.s32.totalorder (!%p243_p10), %s2705_s18, 0  ;;  %p294_p2 = scmp.eq.s32.totalorder (!%p243_p10), %s2701_s17, 0 }
  0x2c   : > { %s2852_s28 = scalar_lea.vmem (!%p243_p10), [#allocation6], %s2009_s5 }
  0x2d   : > { %s3503_s30 = smov (!%p279_p11, %s2010_s30), 63  ;;  %s3505_s7 = smov (!%p285_p12, %s2012_s7), 63 }
  0x2e   : > { %s2011_s8 = sshll.u32 %s3503_s30, 3  ;;  %p292_p1 = pnand %p291_p0, %p290_p13 }
  0x2f   : > { %s2844_s11 = scalar_lea.vmem %s3480_s1, %s2011_s8  ;;  %s2013_s12 = sshll.u32 %s3505_s7, 3 }
  0x30   : > { %s2850_s14 = scalar_lea.vmem %s3481_s2, %s2013_s12  ;;  %p293_p3 = pneg %p292_p1 }
  0x32   : > { %p295_p4 = pnand %p294_p2, %p293_p3 }
  0x34   : > { %298 = sbr.rel (%p295_p4) target bundleno = 93 (0x5d), region = 74 }
  0x39   : > { %v309_v8 = vld [vmem:[%s3482_s3] sm:$0xff]  ;;  %v311_v9 = vld [vmem:[%s3482_s3 + $0x8] sm:$0xff]  ;;  %v313_v10 = vld [vmem:[%s3482_s3 + $0x10] sm:$0xff] }
  0x3a   : > { %310 = vst [vmem:[#allocation2] sm:$0xff] %v309_v8  ;;  %v315_v11 = vld [vmem:[%s3482_s3 + $0x18] sm:$0xff]  ;;  %v317_v12 = vld [vmem:[%s3482_s3 + $0x20] sm:$0xff]  ;;  %v319_v13 = vld [vmem:[%s3482_s3 + $0x28] sm:$0xff] }
  0x3b   : > { %312 = vst [vmem:[#allocation2 + $0x8] sm:$0xff] %v311_v9  ;;  %v321_v14 = vld [vmem:[%s3482_s3 + $0x30] sm:$0xff]  ;;  %v323_v15 = vld [vmem:[%s3482_s3 + $0x38] sm:$0xff]  ;;  %v325_v16 = vld [vmem:[%s3482_s3 + $0x40] sm:$0xff] }
  0x3c   : > { %314 = vst [vmem:[#allocation2 + $0x10] sm:$0xff] %v313_v10  ;;  %v327_v17 = vld [vmem:[%s3482_s3 + $0x48] sm:$0xff]  ;;  %v329_v18 = vld [vmem:[%s3482_s3 + $0x50] sm:$0xff]  ;;  %v331_v19 = vld [vmem:[%s3482_s3 + $0x58] sm:$0xff] }
  0x3d   : > { %316 = vst [vmem:[#allocation2 + $0x18] sm:$0xff] %v315_v11  ;;  %v333_v20 = vld [vmem:[%s3482_s3 + $0x60] sm:$0xff]  ;;  %v335_v21 = vld [vmem:[%s3482_s3 + $0x68] sm:$0xff]  ;;  %v337_v22 = vld [vmem:[%s3482_s3 + $0x70] sm:$0xff] }
  0x3e   : > { %318 = vst [vmem:[#allocation2 + $0x20] sm:$0xff] %v317_v12  ;;  %v339_v23 = vld [vmem:[%s3482_s3 + $0x78] sm:$0xff]  ;;  %v341_v24 = vld [vmem:[%s3482_s3 + $0x80] sm:$0xff]  ;;  %v343_v25 = vld [vmem:[%s3482_s3 + $0x88] sm:$0xff] }
  0x3f   : > { %320 = vst [vmem:[#allocation2 + $0x28] sm:$0xff] %v319_v13  ;;  %v345_v26 = vld [vmem:[%s3482_s3 + $0x90] sm:$0xff]  ;;  %v347_v27 = vld [vmem:[%s3482_s3 + $0x98] sm:$0xff]  ;;  %v349_v28 = vld [vmem:[%s3482_s3 + $0xa0] sm:$0xff] }
  0x40   : > { %322 = vst [vmem:[#allocation2 + $0x30] sm:$0xff] %v321_v14  ;;  %v351_v29 = vld [vmem:[%s3482_s3 + $0xa8] sm:$0xff]  ;;  %v353_v30 = vld [vmem:[%s3482_s3 + $0xb0] sm:$0xff]  ;;  %v355_v31 = vld [vmem:[%s3482_s3 + $0xb8] sm:$0xff] }
  0x41   : > { %324 = vst [vmem:[#allocation2 + $0x38] sm:$0xff] %v323_v15  ;;  %v357_v32 = vld [vmem:[%s3482_s3 + $0xc0] sm:$0xff]  ;;  %v359_v33 = vld [vmem:[%s3482_s3 + $0xc8] sm:$0xff]  ;;  %v361_v34 = vld [vmem:[%s3482_s3 + $0xd0] sm:$0xff] }
  0x42   : > { %326 = vst [vmem:[#allocation2 + $0x40] sm:$0xff] %v325_v16  ;;  %v363_v35 = vld [vmem:[%s3482_s3 + $0xd8] sm:$0xff]  ;;  %v365_v36 = vld [vmem:[%s3482_s3 + $0xe0] sm:$0xff]  ;;  %v367_v37 = vld [vmem:[%s3482_s3 + $0xe8] sm:$0xff] }
  0x43   : > { %328 = vst [vmem:[#allocation2 + $0x48] sm:$0xff] %v327_v17  ;;  %v369_v38 = vld [vmem:[%s3482_s3 + $0xf0] sm:$0xff]  ;;  %v371_v39 = vld [vmem:[%s3482_s3 + $0xf8] sm:$0xff] }
  0x44   : > { %330 = vst [vmem:[#allocation2 + $0x50] sm:$0xff] %v329_v18 }
  0x45   : > { %332 = vst [vmem:[#allocation2 + $0x58] sm:$0xff] %v331_v19 }
  0x46   : > { %334 = vst [vmem:[#allocation2 + $0x60] sm:$0xff] %v333_v20 }
  0x47   : > { %336 = vst [vmem:[#allocation2 + $0x68] sm:$0xff] %v335_v21 }
  0x48   : > { %338 = vst [vmem:[#allocation2 + $0x70] sm:$0xff] %v337_v22 }
  0x49   : > { %340 = vst [vmem:[#allocation2 + $0x78] sm:$0xff] %v339_v23 }
  0x4a   : > { %342 = vst [vmem:[#allocation2 + $0x80] sm:$0xff] %v341_v24 }
  0x4b   : > { %344 = vst [vmem:[#allocation2 + $0x88] sm:$0xff] %v343_v25 }
  0x4c   : > { %346 = vst [vmem:[#allocation2 + $0x90] sm:$0xff] %v345_v26 }
  0x4d   : > { %348 = vst [vmem:[#allocation2 + $0x98] sm:$0xff] %v347_v27 }
  0x4e   : > { %350 = vst [vmem:[#allocation2 + $0xa0] sm:$0xff] %v349_v28 }
  0x4f   : > { %352 = vst [vmem:[#allocation2 + $0xa8] sm:$0xff] %v351_v29 }
  0x50   : > { %354 = vst [vmem:[#allocation2 + $0xb0] sm:$0xff] %v353_v30 }
  0x51   : > { %356 = vst [vmem:[#allocation2 + $0xb8] sm:$0xff] %v355_v31 }
  0x52   : > { %358 = vst [vmem:[#allocation2 + $0xc0] sm:$0xff] %v357_v32 }
  0x53   : > { %360 = vst [vmem:[#allocation2 + $0xc8] sm:$0xff] %v359_v33 }
  0x54   : > { %362 = vst [vmem:[#allocation2 + $0xd0] sm:$0xff] %v361_v34 }
  0x55   : > { %364 = vst [vmem:[#allocation2 + $0xd8] sm:$0xff] %v363_v35 }
  0x56   : > { %366 = vst [vmem:[#allocation2 + $0xe0] sm:$0xff] %v365_v36 }
  0x57   : > { %368 = vst [vmem:[#allocation2 + $0xe8] sm:$0xff] %v367_v37 }
  0x58   : > { %370 = vst [vmem:[#allocation2 + $0xf0] sm:$0xff] %v369_v38 }
  0x59   : > { %372 = vst [vmem:[#allocation2 + $0xf8] sm:$0xff] %v371_v39 }
  0x5a   : > { %378 = vsyncadd [#allocation9], 4096 }
  0x5b   : > { %2685 = dma.done.wait [#allocation9], 4096 }
  0x5c   : > { %2686 = vsyncadd [#allocation9], 4294963200 }
  0x5d PF: > { %p383_p5 = scmp.lt.s32.totalorder %s2709_s19, 0  ;;  %s384_s10 = ssub.s32 0, %s2709_s19 }
  0x5e   : > { %s2014_s7 = smin.u32 %s2709_s19, %s384_s10  ;;  %p2016_p6 = scmp.ne.s32.totalorder %s2701_s17, 0 }
  0x5f   : > { %s386_s12 = sand.u32 1, %s2014_s7  }
  0x60   : > { %s387_s13 = ssub.s32 0, %s386_s12  ;;  %393 = sbr.rel (%p2016_p6) target bundleno = 134 (0x86), region = 98 }
  0x61   : > { %s3507_s13 = smov (!%p383_p5, %s387_s13), %s386_s12 }
  0x62   : > { %s2015_s5 = sshll.u32 %s3507_s13, 9 }
  0x63   : > { %s2958_s15 = ssub.s32 512, %s2015_s5 }
  0x65   : > { %v2727_v40 = vmov 0.0  }
  0x66   : > { %394 = vst [vmem:[#allocation3 + $0xb0] sm:$0xff] %v2727_v40 }
  0x67   : > { %395 = vst [vmem:[#allocation3] sm:$0xff] %v2727_v40 }
  0x68   : > { %396 = vst [vmem:[#allocation3 + $0xd8] sm:$0xff] %v2727_v40 }
  0x69   : > { %397 = vst [vmem:[#allocation3 + $0x18] sm:$0xff] %v2727_v40 }
  0x6a   : > { %398 = vst [vmem:[#allocation3 + $0x50] sm:$0xff] %v2727_v40 }
  0x6b   : > { %399 = vst [vmem:[#allocation3 + $0x68] sm:$0xff] %v2727_v40 }
  0x6c   : > { %400 = vst [vmem:[#allocation3 + $0x30] sm:$0xff] %v2727_v40 }
  0x6d   : > { %401 = vst [vmem:[#allocation3 + $0x48] sm:$0xff] %v2727_v40 }
  0x6e   : > { %402 = vst [vmem:[#allocation3 + $0x80] sm:$0xff] %v2727_v40 }
  0x6f   : > { %403 = vst [vmem:[#allocation3 + $0x88] sm:$0xff] %v2727_v40 }
  0x70   : > { %404 = vst [vmem:[#allocation3 + $0xe8] sm:$0xff] %v2727_v40 }
  0x71   : > { %405 = vst [vmem:[#allocation3 + $0xb8] sm:$0xff] %v2727_v40 }
  0x72   : > { %406 = vst [vmem:[#allocation3 + $0x60] sm:$0xff] %v2727_v40 }
  0x73   : > { %407 = vst [vmem:[#allocation3 + $0xf0] sm:$0xff] %v2727_v40 }
  0x74   : > { %408 = vst [vmem:[#allocation3 + $0x8] sm:$0xff] %v2727_v40 }
  0x75   : > { %409 = vst [vmem:[#allocation3 + $0x78] sm:$0xff] %v2727_v40 }
  0x76   : > { %410 = vst [vmem:[#allocation3 + $0x38] sm:$0xff] %v2727_v40 }
  0x77   : > { %411 = vst [vmem:[#allocation3 + $0x58] sm:$0xff] %v2727_v40 }
  0x78   : > { %412 = vst [vmem:[#allocation3 + $0x40] sm:$0xff] %v2727_v40 }
  0x79   : > { %413 = vst [vmem:[#allocation3 + $0xc8] sm:$0xff] %v2727_v40 }
  0x7a   : > { %414 = vst [vmem:[#allocation3 + $0xe0] sm:$0xff] %v2727_v40 }
  0x7b   : > { %415 = vst [vmem:[#allocation3 + $0x90] sm:$0xff] %v2727_v40 }
  0x7c   : > { %416 = vst [vmem:[#allocation3 + $0x70] sm:$0xff] %v2727_v40 }
  0x7d   : > { %417 = vst [vmem:[#allocation3 + $0xc0] sm:$0xff] %v2727_v40 }
  0x7e   : > { %418 = vst [vmem:[#allocation3 + $0xa8] sm:$0xff] %v2727_v40 }
  0x7f   : > { %419 = vst [vmem:[#allocation3 + $0xd0] sm:$0xff] %v2727_v40 }
  0x80   : > { %420 = vst [vmem:[#allocation3 + $0x10] sm:$0xff] %v2727_v40 }
  0x81   : > { %421 = vst [vmem:[#allocation3 + $0x28] sm:$0xff] %v2727_v40 }
  0x82   : > { %422 = vst [vmem:[#allocation3 + $0xa0] sm:$0xff] %v2727_v40 }
  0x83   : > { %423 = vst [vmem:[#allocation3 + $0xf8] sm:$0xff] %v2727_v40 }
  0x84   : > { %424 = vst [vmem:[#allocation3 + $0x20] sm:$0xff] %v2727_v40 }
  0x85   : > { %425 = vst [vmem:[#allocation3 + $0x98] sm:$0xff] %v2727_v40 }
  0x86 PF: > { %v598_v41 = vld [vmem:[%s2844_s11 + $0x70] sm:$0xff]  ;;  %v596_v42 = vld [vmem:[%s2844_s11 + $0x60] sm:$0xff]  ;;  %v2728_v44 = vmov 0   ;;  %v599_v48 = vld [vmem:[%s2844_s11 + $0x78] sm:$0xff]  ;;  %s2017_s29 = sshll.u32 %s2701_s17, 7  ;;  %p2115_p7 = scmp.ne.s32.totalorder %s2701_s17, 3 }
  0x87   : > { %v594_v43 = vld [vmem:[%s2844_s11 + $0x50] sm:$0xff]  ;;  %2617 = vset.pattern.permute.xlu2 %v2728_v44  ;;  %2616 = vset.pattern.permute.xlu1 %v2728_v44  ;;  %v614_v45 = vpack.c.bf16 %v598_v41, %v598_v41  ;;  %v612_v46 = vpack.c.bf16 %v596_v42, %v596_v42  ;;  %v597_v49 = vld [vmem:[%s2844_s11 + $0x68] sm:$0xff]  ;;  %v595_v50 = vld [vmem:[%s2844_s11 + $0x58] sm:$0xff]  ;;  %v615_v51 = vpack.c.bf16 %v599_v48, %v599_v48  ;;  %s563_s30 = sadd.s32 %s2017_s29, %s2015_s5  ;;  %v2729_v10 = vmov 839922192   ;;  %s3074_s17 = sshll.u32 (!%p2115_p7), %s2705_s18, 8 }
  0x88   : > { %v610_v47 = vpack.c.bf16 %v594_v43, %v594_v43  ;;  %2615 = vset.pattern.permute.xlu0 %v2728_v44  ;;  %v613_v52 = vpack.c.bf16 %v597_v49, %v597_v49  ;;  %v611_v53 = vpack.c.bf16 %v595_v50, %v595_v50  ;;  %v593_v54 = vld [vmem:[%s2844_s11 + $0x48] sm:$0xff]  ;;  %v592_v55 = vld [vmem:[%s2844_s11 + $0x40] sm:$0xff]  ;;  %v590_v56 = vld [vmem:[%s2844_s11 + $0x30] sm:$0xff]  ;;  %v622_v11 = vunpack.c.l.s4 %v2729_v10  ;;  %s564_s8 = sshra.s32 %s563_s30, 3  ;;  %p2118_p8 = scmp.ne.s32.totalorder (!%p2115_p7), %s2709_s19, 0 }
  0x89   : > { %744 = vperm.xlu0 %2615, %v614_v45   ;;  %726 = vperm.xlu1 %2616, %v612_v46   ;;  %v609_v57 = vpack.c.bf16 %v593_v54, %v593_v54  ;;  %v608_v58 = vpack.c.bf16 %v592_v55, %v592_v55  ;;  %v606_v59 = vpack.c.bf16 %v590_v56, %v590_v56  ;;  %v591_v60 = vld [vmem:[%s2844_s11 + $0x38] sm:$0xff]  ;;  %v588_v61 = vld [vmem:[%s2844_s11 + $0x20] sm:$0xff]  ;;  %v589_v62 = vld [vmem:[%s2844_s11 + $0x28] sm:$0xff]  ;;  %s2018_s9 = sshll.u32 %s564_s8, 2 }
  0x8a   : > { %708 = vperm.xlu2 %2617, %v610_v47   ;;  %v607_v63 = vpack.c.bf16 %v591_v60, %v591_v60  ;;  %v604_v0 = vpack.c.bf16 %v588_v61, %v588_v61  ;;  %v605_v1 = vpack.c.bf16 %v589_v62, %v589_v62  ;;  %v587_v2 = vld [vmem:[%s2844_s11 + $0x18] sm:$0xff]  ;;  %v586_v3 = vld [vmem:[%s2844_s11 + $0x10] sm:$0xff]  ;;  %v584_v4 = vld [vmem:[%s2844_s11] sm:$0xff]  ;;  %v2980_v13 = vunpack.c.0.s8 %v622_v11  ;;  %s2983_s10 = scalar_lea.vmem [#allocation2], %s2018_s9 }
  0x8b   : > { %v603_v5 = vpack.c.bf16 %v587_v2, %v587_v2  ;;  %v602_v6 = vpack.c.bf16 %v586_v3, %v586_v3  ;;  %v600_v7 = vpack.c.bf16 %v584_v4, %v584_v4  ;;  %v585_v8 = vld [vmem:[%s2844_s11 + $0x8] sm:$0xff]  ;;  %v2468_v27 = vld [vmem:[%s2983_s10 + $0x38] sm:$0xff]   ;;  %v2467_v29 = vld [vmem:[%s2983_s10 + $0x30] sm:$0xff]   ;;  %s1478_s11 = sadd.s32 (!%p2115_p7), %s3074_s17, %s2958_s15 }
  0x8c   : > { %v601_v9 = vpack.c.bf16 %v585_v8, %v585_v8  ;;  %v2466_v15 = vld [vmem:[%s2983_s10 + $0x28] sm:$0xff]   ;;  %v2261_v31 = vunpack.c.l.bf16 %v2468_v27  ;;  %v2257_v32 = vunpack.c.l.bf16 %v2467_v29  ;;  %v2262_v34 = vunpack.c.h.bf16 %v2468_v27  ;;  %v2465_v44 = vld [vmem:[%s2983_s10 + $0x20] sm:$0xff]  }
  0x8d   : > { %v2253_v16 = vunpack.c.l.bf16 %v2466_v15  ;;  %v2254_v19 = vunpack.c.h.bf16 %v2466_v15  ;;  %v2258_v36 = vunpack.c.h.bf16 %v2467_v29  ;;  %v2250_v49 = vunpack.c.h.bf16 %v2465_v44 }
  0x8e   : > { %v2249_v50 = vunpack.c.l.bf16 %v2465_v44 }
  0x91   : > { %753 = vperm.xlu0 %2615, %v615_v51   ;;  %735 = vperm.xlu1 %2616, %v613_v52   ;;  %v2995_v51 = vld [vmem:[%s2852_s28] sm:$0xff]  ;;  %v2998_v52 = vld [vmem:[%s2852_s28 + $0x10] sm:$0xff] }
  0x92   : > { %717 = vperm.xlu2 %2617, %v611_v53   ;;  %v3001_v53 = vld [vmem:[%s2852_s28 + $0x20] sm:$0xff]  ;;  %v434_v56 = vunpack.c.0.s8 %v2995_v51  ;;  %v442_v60 = vunpack.c.0.s8 %v2998_v52  ;;  %v443_v61 = vunpack.c.1.s8 %v2998_v52 }
  0x93   : > { %v450_v62 = vunpack.c.0.s8 %v3001_v53 }
  0x94   : > { %v466_v3 = vcvt.s32.f32 %v434_v56  ;;  %v444_v56 = vunpack.c.2.s8 %v2998_v52 }
  0x99   : > { %699 = vperm.xlu1 %2616, %v609_v57   ;;  %690 = vperm.xlu0 %2615, %v608_v58   ;;  %v435_v57 = vunpack.c.1.s8 %v2995_v51 }
  0x9a   : > { %672 = vperm.xlu2 %2617, %v606_v59  }
  0x9b   : > { %v467_v4 = vcvt.s32.f32 %v435_v57  ;;  %v445_v57 = vunpack.c.3.s8 %v2998_v52 }
  0x9d   : > { %v2154_v11 = vpack.c.bf16 %v467_v4, %v466_v3  ;;  %v476_v3 = vcvt.s32.f32 %v444_v56  ;;  %v477_v4 = vcvt.s32.f32 %v445_v57 }
  0x9f   : > { %2155 = vst [vmem:[#allocation4] sm:$0xff] %v2154_v11  }
  0xa1   : > { %681 = vperm.xlu0 %2615, %v607_v63   ;;  %654 = vperm.xlu1 %2616, %v604_v0   ;;  %v451_v63 = vunpack.c.1.s8 %v3001_v53  ;;  %v3010_v0 = vld [vmem:[%s2852_s28 + $0x30] sm:$0xff] }
  0xa2   : > { %663 = vperm.xlu2 %2617, %v605_v1   ;;  %v461_v11 = vunpack.c.3.s8 %v3010_v0 }
  0xa3   : > { %v483_v8 = vcvt.s32.f32 %v451_v63  ;;  %v452_v63 = vunpack.c.2.s8 %v3001_v53 }
  0xa9   : > { %645 = vperm.xlu1 %2616, %v603_v5   ;;  %636 = vperm.xlu0 %2615, %v602_v6   ;;  %v474_v5 = vcvt.s32.f32 %v442_v60  ;;  %v475_v6 = vcvt.s32.f32 %v443_v61 }
  0xaa   : > { %618 = vperm.xlu2 %2617, %v600_v7   ;;  %v482_v7 = vcvt.s32.f32 %v450_v62 }
  0xb1   : > { %627 = vperm.xlu0 %2615, %v601_v9  }
  0xe4   : > { %v709_v12 = vpop.permute.xlu2 %708 }
  0xe5   : > { %v714_v14 = vperm.slane %v709_v12, %v2980_v13  ;;  %v458_v12 = vunpack.c.0.s8 %v3010_v0 }
  0xe7   : > { %v786_v17 = vunpack.c.l.bf16 %v714_v14  ;;  %v2464_v14 = vld [vmem:[%s2983_s10 + $0x18] sm:$0xff]  }
  0xe9   : > { %v802_v21 = vmul.f32 %v2253_v16, %v786_v17  ;;  %v2174_v17 = vpack.c.bf16 %v475_v6, %v474_v5  ;;  %v484_v6 = vcvt.s32.f32 %v452_v63 }
  0xeb   : > { %2450 = vst [vmem:[#allocation4 + $0x8] sm:$0xff] %v2174_v17  }
  0xec   : > { %v718_v18 = vpop.permute.xlu2 %717 }
  0xed   : > { %v723_v20 = vperm.slane %v718_v18, %v2980_v13  ;;  %v2194_v18 = vpack.c.bf16 %v483_v8, %v482_v7  ;;  %v460_v8 = vunpack.c.2.s8 %v3010_v0 }
  0xef   : > { %v787_v22 = vunpack.c.l.bf16 %v723_v20  ;;  %v2463_v20 = vld [vmem:[%s2983_s10 + $0x10] sm:$0xff]   ;;  %2454 = vst [vmem:[#allocation4 + $0x70] sm:$0xff] %v2194_v18  }
  0xf0   : > { %v2242_v29 = vunpack.c.h.bf16 %v2463_v20 }
  0xf1   : > { %v803_v23 = vmul.f32 %v2254_v19, %v787_v22  ;;  %v459_v19 = vunpack.c.1.s8 %v3010_v0 }
  0xf3   : > { %v2291_v24 = vpack.c.bf16 %v803_v23, %v802_v21 }
  0xf4   : > { %v673_v41 = vpop.permute.xlu2 %672 }
  0xf5   : > { %2473 = vst [vmem:[#allocation5 + $0x20] sm:$0xff] %v2291_v24   ;;  %v678_v15 = vperm.slane %v673_v41, %v2980_v13  ;;  %v490_v24 = vcvt.s32.f32 %v458_v12  ;;  %v2462_v41 = vld [vmem:[%s2983_s10 + $0x8] sm:$0xff]  }
  0xf6   : > { %v2135_v63 = vld [vmem:[#allocation4 + $0x70] sm:$0xff] }
  0xfb   : > { %v745_v25 = vpop.permute.xlu0 %744  ;;  %v727_v26 = vpop.permute.xlu1 %726 }
  0xfc   : > { %v750_v28 = vperm.slane %v745_v25, %v2980_v13  ;;  %v732_v30 = vperm.slane %v727_v26, %v2980_v13  ;;  %v664_v16 = vpop.permute.xlu2 %663  ;;  %v491_v25 = vcvt.s32.f32 %v459_v19  ;;  %v2245_v26 = vunpack.c.l.bf16 %v2464_v14  ;;  %v2148_v60 = vld [vmem:[#allocation5 + $0x20] sm:$0xff] }
  0xfd   : > { %v669_v21 = vperm.slane %v664_v16, %v2980_v13  ;;  %v493_v19 = vcvt.s32.f32 %v461_v11 }
  0xfe   : > { %v790_v37 = vunpack.c.l.bf16 %v750_v28  ;;  %v788_v38 = vunpack.c.l.bf16 %v732_v30  ;;  %v782_v28 = vunpack.c.l.bf16 %v678_v15  ;;  %v492_v15 = vcvt.s32.f32 %v460_v8 }
 0x100   : > { %v806_v45 = vmul.f32 %v2261_v31, %v790_v37  ;;  %v804_v46 = vmul.f32 %v2257_v32, %v788_v38  ;;  %v2246_v31 = vunpack.c.h.bf16 %v2464_v14  ;;  %v2241_v37 = vunpack.c.l.bf16 %v2463_v20  ;;  %v2232_v20 = vld [vmem:[%s2983_s10] sm:$0xff]  }
 0x103   : > { %v754_v33 = vpop.permute.xlu0 %753  ;;  %v736_v35 = vpop.permute.xlu1 %735 }
 0x104   : > { %v759_v39 = vperm.slane %v754_v33, %v2980_v13  ;;  %v741_v40 = vperm.slane %v736_v35, %v2980_v13  ;;  %v781_v35 = vunpack.c.l.bf16 %v669_v21  ;;  %v619_v5 = vpop.permute.xlu2 %618 }
 0x105   : > { %v624_v16 = vperm.slane %v619_v5, %v2980_v13 }
 0x106   : > { %v791_v42 = vunpack.c.l.bf16 %v759_v39  ;;  %v789_v43 = vunpack.c.l.bf16 %v741_v40  ;;  %v797_v44 = vmul.f32 %v2242_v29, %v781_v35 }
 0x108   : > { %v807_v47 = vmul.f32 %v2262_v34, %v791_v42  ;;  %v805_v48 = vmul.f32 %v2258_v36, %v789_v43  ;;  %v2214_v34 = vpack.c.bf16 %v491_v25, %v490_v24  ;;  %v798_v43 = vmul.f32 %v2245_v26, %v782_v28 }
 0x109   : > { %v2233_v24 = vunpack.c.l.bf16 %v2232_v20  ;;  %v776_v25 = vunpack.c.l.bf16 %v624_v16  ;;  %v2234_v26 = vunpack.c.h.bf16 %v2232_v20 }
 0x10a   : > { %v2301_v54 = vpack.c.bf16 %v807_v47, %v806_v45  ;;  %v2296_v55 = vpack.c.bf16 %v805_v48, %v804_v46  ;;  %2458 = vst [vmem:[#allocation4 + $0x10] sm:$0xff] %v2214_v34   ;;  %v2238_v47 = vunpack.c.h.bf16 %v2462_v41  ;;  %v2237_v48 = vunpack.c.l.bf16 %v2462_v41  ;;  %v431_v34 = vld [vmem:[%s2852_s28 + $0x28] sm:$0xff] }
 0x10b   : > { %v700_v58 = vpop.permute.xlu1 %699  ;;  %v691_v59 = vpop.permute.xlu0 %690  ;;  %v454_v41 = vunpack.c.0.s8 %v431_v34  ;;  %v456_v5 = vunpack.c.2.s8 %v431_v34 }
 0x10c   : > { %2475 = vst [vmem:[#allocation5 + $0x8] sm:$0xff] %v2301_v54   ;;  %v705_v1 = vperm.slane %v700_v58, %v2980_v13  ;;  %v696_v2 = vperm.slane %v691_v59, %v2980_v13 }
 0x10d   : > { %2474 = vst [vmem:[#allocation5] sm:$0xff] %v2296_v55   ;;  %v488_v11 = vcvt.s32.f32 %v456_v5 }
 0x10e   : > { %v785_v9 = vunpack.c.l.bf16 %v705_v1  ;;  %v784_v10 = vunpack.c.l.bf16 %v696_v2  ;;  %v453_v1 = vunpack.c.3.s8 %v3001_v53  ;;  %v2179_v53 = vpack.c.bf16 %v477_v4, %v476_v3 }
 0x110   : > { %v801_v22 = vmul.f32 %v2250_v49, %v785_v9  ;;  %v800_v23 = vmul.f32 %v2249_v50, %v784_v10  ;;  %v436_v49 = vunpack.c.2.s8 %v2995_v51  ;;  %v437_v50 = vunpack.c.3.s8 %v2995_v51  ;;  %2451 = vst [vmem:[#allocation4 + $0x50] sm:$0xff] %v2179_v53  }
 0x111   : > { %v485_v7 = vcvt.s32.f32 %v453_v1  ;;  %v2139_v1 = vld [vmem:[#allocation4 + $0x10] sm:$0xff] }
 0x112   : > { %v2286_v27 = vpack.c.bf16 %v801_v22, %v800_v23  ;;  %v468_v61 = vcvt.s32.f32 %v436_v49  ;;  %v469_v62 = vcvt.s32.f32 %v437_v50  ;;  %v2219_v22 = vpack.c.bf16 %v493_v19, %v492_v15 }
 0x113   : > { %v682_v30 = vpop.permute.xlu0 %681  ;;  %v655_v32 = vpop.permute.xlu1 %654  ;;  %v2150_v33 = vld [vmem:[#allocation5 + $0x8] sm:$0xff]  ;;  %v2199_v14 = vpack.c.bf16 %v485_v7, %v484_v6  ;;  %v486_v49 = vcvt.s32.f32 %v454_v41 }
 0x114   : > { %2472 = vst [vmem:[#allocation5 + $0x28] sm:$0xff] %v2286_v27   ;;  %v687_v36 = vperm.slane %v682_v30, %v2980_v13  ;;  %v660_v38 = vperm.slane %v655_v32, %v2980_v13  ;;  %1064 = vmatpush.bf16.msra.mxu0 %v2150_v33  ;;  %2506 = vmatpush.bf16.msra.mxu1 %v2150_v33  ;;  %v2149_v42 = vld [vmem:[#allocation5] sm:$0xff]  ;;  %v427_v32 = vld [vmem:[%s2852_s28 + $0x8] sm:$0xff] }
 0x115   : > { %2507 = vmatpush.bf16.msra.mxu2 %v2150_v33  ;;  %2508 = vmatpush.bf16.msra.mxu3 %v2150_v33  ;;  %v2159_v52 = vpack.c.bf16 %v469_v62, %v468_v61  ;;  %2455 = vst [vmem:[#allocation4 + $0x60] sm:$0xff] %v2199_v14   ;;  %v792_v30 = vmul.f32 %v2233_v24, %v776_v25  ;;  %v429_v33 = vld [vmem:[%s2852_s28 + $0x18] sm:$0xff]  ;;  %v2127_v61 = vld [vmem:[#allocation4] sm:$0xff]  ;;  %v2131_v62 = vld [vmem:[#allocation4 + $0x8] sm:$0xff] }
 0x116   : > { %v783_v39 = vunpack.c.l.bf16 %v687_v36  ;;  %v780_v40 = vunpack.c.l.bf16 %v660_v38  ;;  %2459 = vst [vmem:[#allocation4 + $0x30] sm:$0xff] %v2219_v22   ;;  %v438_v36 = vunpack.c.0.s8 %v427_v32  ;;  %v433_v38 = vld [vmem:[%s2852_s28 + $0x38] sm:$0xff]  ;;  %v448_v3 = vunpack.c.2.s8 %v429_v33  ;;  %s1511_s28 = sshra.s32 (!%p2115_p7), %s1478_s11, 3 }
 0x117   : > { %2447 = vst [vmem:[#allocation4 + $0x48] sm:$0xff] %v2159_v52   ;;  %v449_v4 = vunpack.c.3.s8 %v429_v33  ;;  %v457_v52 = vunpack.c.3.s8 %v431_v34  ;;  %v464_v8 = vunpack.c.2.s8 %v433_v38  ;;  %s2117_s7 = sshll.u32 (!%p2115_p7), %s1511_s28, 2 }
 0x118   : > { %v799_v45 = vmul.f32 %v2246_v31, %v783_v39  ;;  %v796_v46 = vmul.f32 %v2241_v37, %v780_v40  ;;  %1065 = vmatpush.bf16.msra.mxu0 %v2149_v42  ;;  %2509 = vmatpush.bf16.msra.mxu1 %v2149_v42  ;;  %v446_v37 = vunpack.c.0.s8 %v429_v33  ;;  %v447_v40 = vunpack.c.1.s8 %v429_v33 }
 0x119   : > { %2510 = vmatpush.bf16.msra.mxu2 %v2149_v42  ;;  %2511 = vmatpush.bf16.msra.mxu3 %v2149_v42  ;;  %v455_v42 = vunpack.c.1.s8 %v431_v34  ;;  %v481_v53 = vcvt.s32.f32 %v449_v4  ;;  %v496_v15 = vcvt.s32.f32 %v464_v8 }
 0x11a   : > { %v2281_v54 = vpack.c.bf16 %v799_v45, %v798_v43  ;;  %v2276_v55 = vpack.c.bf16 %v797_v44, %v796_v46  ;;  %v462_v43 = vunpack.c.0.s8 %v433_v38  ;;  %v470_v44 = vcvt.s32.f32 %v438_v36 }
 0x11b   : > { %v646_v58 = vpop.permute.xlu1 %645  ;;  %v637_v59 = vpop.permute.xlu0 %636  ;;  %v2147_v12 = vld [vmem:[#allocation5 + $0x28] sm:$0xff]  ;;  %v478_v46 = vcvt.s32.f32 %v446_v37  ;;  %v487_v50 = vcvt.s32.f32 %v455_v42 }
 0x11c   : > { %2471 = vst [vmem:[#allocation5 + $0x30] sm:$0xff] %v2281_v54   ;;  %v651_v51 = vperm.slane %v646_v58, %v2980_v13  ;;  %v642_v2 = vperm.slane %v637_v59, %v2980_v13  ;;  %1066 = vmatpush.bf16.msra.mxu0 %v2148_v60  ;;  %2512 = vmatpush.bf16.msra.mxu1 %v2148_v60  ;;  %v494_v54 = vcvt.s32.f32 %v462_v43  ;;  %v2136_v22 = vld [vmem:[#allocation4 + $0x60] sm:$0xff]  ;;  %v864_v37 = vld [vmem:[#allocation3 + $0xa8] sm:$0xff] }
 0x11d   : > { %2470 = vst [vmem:[#allocation5 + $0x38] sm:$0xff] %v2276_v55   ;;  %2513 = vmatpush.bf16.msra.mxu2 %v2148_v60  ;;  %2514 = vmatpush.bf16.msra.mxu3 %v2148_v60  ;;  %v2204_v58 = vpack.c.bf16 %v487_v50, %v486_v49  ;;  %v865_v49 = vld [vmem:[#allocation3 + $0xd0] sm:$0xff]  ;;  %v842_v50 = vld [vmem:[#allocation3 + $0xd8] sm:$0xff] }
 0x11e   : > { %v779_v9 = vunpack.c.l.bf16 %v651_v51  ;;  %v778_v10 = vunpack.c.l.bf16 %v642_v2  ;;  %v440_v51 = vunpack.c.2.s8 %v427_v32  ;;  %v441_v2 = vunpack.c.3.s8 %v427_v32  ;;  %v2128_v20 = vld [vmem:[#allocation4 + $0x48] sm:$0xff] }
 0x11f   : > { %2456 = vst [vmem:[#allocation4 + $0x18] sm:$0xff] %v2204_v58  }
 0x120   : > { %v795_v17 = vmul.f32 %v2238_v47, %v779_v9  ;;  %v794_v18 = vmul.f32 %v2237_v48, %v778_v10  ;;  %1067 = vmatpush.bf16.msra.mxu0 %v2147_v12  ;;  %2515 = vmatpush.bf16.msra.mxu1 %v2147_v12  ;;  %v463_v47 = vunpack.c.1.s8 %v433_v38  ;;  %v479_v48 = vcvt.s32.f32 %v447_v40 }
 0x121   : > { %2516 = vmatpush.bf16.msra.mxu2 %v2147_v12  ;;  %2517 = vmatpush.bf16.msra.mxu3 %v2147_v12  ;;  %v472_v6 = vcvt.s32.f32 %v440_v51  ;;  %v473_v7 = vcvt.s32.f32 %v441_v2  ;;  %v465_v9 = vunpack.c.3.s8 %v433_v38  ;;  %v480_v10 = vcvt.s32.f32 %v448_v3  ;;  %v841_v38 = vld [vmem:[#allocation3] sm:$0xff]  ;;  %v843_v51 = vld [vmem:[#allocation3 + $0x18] sm:$0xff] }
 0x122   : > { %v2271_v21 = vpack.c.bf16 %v795_v17, %v794_v18  ;;  %v495_v56 = vcvt.s32.f32 %v463_v47  ;;  %v2184_v57 = vpack.c.bf16 %v479_v48, %v478_v46  ;;  %v489_v12 = vcvt.s32.f32 %v457_v52  ;;  %v857_v48 = vld [vmem:[#allocation3 + $0x58] sm:$0xff] }
 0x123   : > { %v628_v23 = vpop.permute.xlu0 %627  ;;  %v2146_v0 = vld [vmem:[#allocation5 + $0x30] sm:$0xff]  ;;  %v2169_v14 = vpack.c.bf16 %v473_v7, %v472_v6  ;;  %v497_v16 = vcvt.s32.f32 %v465_v9  ;;  %v2189_v17 = vpack.c.bf16 %v481_v53, %v480_v10  ;;  %v851_v2 = vld [vmem:[#allocation3 + $0xb8] sm:$0xff]  ;;  %v859_v10 = vld [vmem:[#allocation3 + $0xc8] sm:$0xff] }
 0x124   : > { %2469 = vst [vmem:[#allocation5 + $0x10] sm:$0xff] %v2271_v21   ;;  %v633_v27 = vperm.slane %v628_v23, %v2980_v13  ;;  %1068 = vmatpush.bf16.msra.mxu0 %v2146_v0  ;;  %2518 = vmatpush.bf16.msra.mxu1 %v2146_v0  ;;  %v2145_v29 = vld [vmem:[#allocation5 + $0x38] sm:$0xff]  ;;  %v439_v13 = vunpack.c.1.s8 %v427_v32  ;;  %v2224_v59 = vpack.c.bf16 %v495_v56, %v494_v54  ;;  %v2132_v21 = vld [vmem:[#allocation4 + $0x50] sm:$0xff]  ;;  %v848_v32 = vld [vmem:[#allocation3 + $0x80] sm:$0xff] }
 0x125   : > { %2519 = vmatpush.bf16.msra.mxu2 %v2146_v0  ;;  %2520 = vmatpush.bf16.msra.mxu3 %v2146_v0  ;;  %2452 = vst [vmem:[#allocation4 + $0x40] sm:$0xff] %v2184_v57   ;;  %v2209_v18 = vpack.c.bf16 %v489_v12, %v488_v11  ;;  %v2229_v19 = vpack.c.bf16 %v497_v16, %v496_v15  ;;  %v2140_v23 = vld [vmem:[#allocation4 + $0x30] sm:$0xff]  ;;  %v850_v54 = vld [vmem:[#allocation3 + $0xe8] sm:$0xff]  ;;  %v852_v12 = vld [vmem:[#allocation3 + $0x60] sm:$0xff] }
 0x126   : > { %v777_v28 = vunpack.c.l.bf16 %v633_v27  ;;  %v471_v45 = vcvt.s32.f32 %v439_v13  ;;  %2460 = vst [vmem:[#allocation4 + $0x28] sm:$0xff] %v2224_v59   ;;  %v2137_v25 = vld [vmem:[#allocation4 + $0x18] sm:$0xff]  ;;  %v867_v53 = vld [vmem:[#allocation3 + $0x28] sm:$0xff]  ;;  %v844_v11 = vld [vmem:[#allocation3 + $0x50] sm:$0xff] }
 0x127   : > { %2449 = vst [vmem:[#allocation4 + $0x78] sm:$0xff] %v2169_v14   ;;  %v856_v13 = vld [vmem:[#allocation3 + $0x38] sm:$0xff] }
 0x128   : > { %v793_v31 = vmul.f32 %v2234_v26, %v777_v28  ;;  %1069 = vmatpush.bf16.msra.mxu0 %v2145_v29  ;;  %2521 = vmatpush.bf16.msra.mxu1 %v2145_v29  ;;  %v2164_v55 = vpack.c.bf16 %v471_v45, %v470_v44  ;;  %2453 = vst [vmem:[#allocation4 + $0x38] sm:$0xff] %v2189_v17  }
 0x129   : > { %2522 = vmatpush.bf16.msra.mxu2 %v2145_v29  ;;  %2523 = vmatpush.bf16.msra.mxu3 %v2145_v29  ;;  %2457 = vst [vmem:[#allocation4 + $0x20] sm:$0xff] %v2209_v18  }
 0x12a   : > { %v2266_v35 = vpack.c.bf16 %v793_v31, %v792_v30  ;;  %2448 = vst [vmem:[#allocation4 + $0x68] sm:$0xff] %v2164_v55   ;;  %v840_v31 = vld [vmem:[#allocation3 + $0xb0] sm:$0xff] }
 0x12b   : > { %v2144_v39 = vld [vmem:[#allocation5 + $0x10] sm:$0xff]  ;;  %2461 = vst [vmem:[#allocation4 + $0x58] sm:$0xff] %v2229_v19  }
 0x12c   : > { %2267 = vst [vmem:[#allocation5 + $0x18] sm:$0xff] %v2266_v35   ;;  %1070 = vmatpush.bf16.msra.mxu0 %v2144_v39  ;;  %2524 = vmatpush.bf16.msra.mxu1 %v2144_v39  ;;  %v2133_v24 = vld [vmem:[#allocation4 + $0x40] sm:$0xff] }
 0x12d   : > { %2525 = vmatpush.bf16.msra.mxu2 %v2144_v39  ;;  %2526 = vmatpush.bf16.msra.mxu3 %v2144_v39  ;;  %v2141_v26 = vld [vmem:[#allocation4 + $0x28] sm:$0xff] }
 0x12e   : > { %v2130_v27 = vld [vmem:[#allocation4 + $0x78] sm:$0xff]  ;;  %v849_v39 = vld [vmem:[#allocation3 + $0x88] sm:$0xff] }
 0x12f   : > { %v2134_v28 = vld [vmem:[#allocation4 + $0x38] sm:$0xff] }
 0x130   : > { %v2138_v29 = vld [vmem:[#allocation4 + $0x20] sm:$0xff] }
 0x131   : > { %v2129_v0 = vld [vmem:[#allocation4 + $0x68] sm:$0xff] }
 0x132   : > { %v2142_v30 = vld [vmem:[#allocation4 + $0x58] sm:$0xff] }
 0x133   : > { %v2143_v60 = vld [vmem:[#allocation5 + $0x18] sm:$0xff] }
 0x134   : > { %1071 = vmatpush.bf16.msra.mxu0 %v2143_v60  ;;  %2527 = vmatpush.bf16.msra.mxu1 %v2143_v60 }
 0x135   : > { %2528 = vmatpush.bf16.msra.mxu2 %v2143_v60  ;;  %2529 = vmatpush.bf16.msra.mxu3 %v2143_v60 }
 0x137   : > { %1072 = vmatmul.bf16.vlgmr.msra.gmra.mxu0 %v2127_v61  ;;  %1092 = vmatmul.bf16.vlgmr.msra.gmra.mxu1 %v2131_v62 }
 0x138   : > { %1112 = vmatmul.bf16.vlgmr.msra.gmra.mxu2 %v2135_v63  ;;  %1132 = vmatmul.bf16.vlgmr.msra.gmra.mxu3 %v2139_v1  ;;  %v858_v63 = vld [vmem:[#allocation3 + $0x40] sm:$0xff]  ;;  %v866_v1 = vld [vmem:[#allocation3 + $0x10] sm:$0xff] }
 0x147   : > { %1077 = vmatmul.bf16.gmra.mxu0 %v2128_v20  ;;  %1097 = vmatmul.bf16.gmra.mxu1 %v2132_v21 }
 0x148   : > { %1117 = vmatmul.bf16.gmra.mxu2 %v2136_v22  ;;  %1137 = vmatmul.bf16.gmra.mxu3 %v2140_v23  ;;  %v860_v22 = vld [vmem:[#allocation3 + $0xe0] sm:$0xff] }
 0x149   : > { %v868_v23 = vld [vmem:[#allocation3 + $0xa0] sm:$0xff] }
 0x157   : > { %1082 = vmatmul.bf16.gmra.mxu0 %v2129_v0  ;;  %1102 = vmatmul.bf16.gmra.mxu1 %v2133_v24  ;;  %v845_v0 = vld [vmem:[#allocation3 + $0x68] sm:$0xff]  ;;  %v853_v24 = vld [vmem:[#allocation3 + $0xf0] sm:$0xff] }
 0x158   : > { %1122 = vmatmul.bf16.gmra.mxu2 %v2137_v25  ;;  %1142 = vmatmul.bf16.gmra.mxu3 %v2141_v26 }
 0x167   : > { %1087 = vmatmul.bf16.gmra.mxu0 %v2130_v27  ;;  %1107 = vmatmul.bf16.gmra.mxu1 %v2134_v28 }
 0x168   : > { %1127 = vmatmul.bf16.gmra.mxu2 %v2138_v29  ;;  %1147 = vmatmul.bf16.gmra.mxu3 %v2142_v30 }
 0x1b4   : > { %v1073_v33 = vpop.f32.mrf.mxu0  ;;  %v1093_v34 = vpop.f32.mrf.mxu1 }
 0x1b5   : > { %v1153_v35 = vadd.f32 %v1073_v33, %v840_v31  ;;  %v1161_v36 = vadd.f32 %v1093_v34, %v848_v32  ;;  %v861_v33 = vld [vmem:[#allocation3 + $0x90] sm:$0xff]  ;;  %v869_v34 = vld [vmem:[#allocation3 + $0xf8] sm:$0xff] }
 0x1b7   : > { %1185 = vst [vmem:[#allocation3 + $0xb0] sm:$0xff] %v1153_v35  ;;  %v846_v35 = vld [vmem:[#allocation3 + $0x30] sm:$0xff] }
 0x1b8   : > { %1193 = vst [vmem:[#allocation3 + $0x80] sm:$0xff] %v1161_v36  ;;  %v854_v36 = vld [vmem:[#allocation3 + $0x8] sm:$0xff] }
 0x1bb   : > { %v1113_v40 = vpop.f32.mrf.mxu2  ;;  %v1133_v41 = vpop.f32.mrf.mxu3 }
 0x1bc   : > { %v1169_v42 = vadd.f32 %v1113_v40, %v856_v13  ;;  %v1177_v43 = vadd.f32 %v1133_v41, %v864_v37  ;;  %v1075_v44 = vpop.f32.mrf.mxu0  ;;  %v1095_v45 = vpop.f32.mrf.mxu1 }
 0x1bd   : > { %v1154_v46 = vadd.f32 %v1075_v44, %v841_v38  ;;  %v1162_v47 = vadd.f32 %v1095_v45, %v849_v39  ;;  %v862_v44 = vld [vmem:[#allocation3 + $0x70] sm:$0xff]  ;;  %v870_v45 = vld [vmem:[#allocation3 + $0x20] sm:$0xff] }
 0x1be   : > { %1201 = vst [vmem:[#allocation3 + $0x38] sm:$0xff] %v1169_v42 }
 0x1bf   : > { %1209 = vst [vmem:[#allocation3 + $0xa8] sm:$0xff] %v1177_v43 }
 0x1c0   : > { %1186 = vst [vmem:[#allocation3] sm:$0xff] %v1154_v46  ;;  %v847_v46 = vld [vmem:[#allocation3 + $0x48] sm:$0xff] }
 0x1c1   : > { %1194 = vst [vmem:[#allocation3 + $0x88] sm:$0xff] %v1162_v47  ;;  %v855_v47 = vld [vmem:[#allocation3 + $0x78] sm:$0xff] }
 0x1c3   : > { %v1115_v55 = vpop.f32.mrf.mxu2  ;;  %v1135_v56 = vpop.f32.mrf.mxu3 }
 0x1c4   : > { %v1170_v57 = vadd.f32 %v1115_v55, %v857_v48  ;;  %v1178_v58 = vadd.f32 %v1135_v56, %v865_v49  ;;  %v1078_v59 = vpop.f32.mrf.mxu0  ;;  %v1098_v60 = vpop.f32.mrf.mxu1 }
 0x1c5   : > { %v1155_v61 = vadd.f32 %v1078_v59, %v842_v50  ;;  %v1163_v62 = vadd.f32 %v1098_v60, %v850_v54  ;;  %v863_v59 = vld [vmem:[#allocation3 + $0xc0] sm:$0xff]  ;;  %v871_v60 = vld [vmem:[#allocation3 + $0x98] sm:$0xff] }
 0x1c6   : > { %1202 = vst [vmem:[#allocation3 + $0x58] sm:$0xff] %v1170_v57 }
 0x1c7   : > { %1210 = vst [vmem:[#allocation3 + $0xd0] sm:$0xff] %v1178_v58 }
 0x1c8   : > { %1187 = vst [vmem:[#allocation3 + $0xd8] sm:$0xff] %v1155_v61 }
 0x1c9   : > { %1195 = vst [vmem:[#allocation3 + $0xe8] sm:$0xff] %v1163_v62 }
 0x1cb   : > { %v1118_v3 = vpop.f32.mrf.mxu2  ;;  %v1138_v4 = vpop.f32.mrf.mxu3 }
 0x1cc   : > { %v1171_v5 = vadd.f32 %v1118_v3, %v858_v63  ;;  %v1179_v52 = vadd.f32 %v1138_v4, %v866_v1  ;;  %v1080_v6 = vpop.f32.mrf.mxu0  ;;  %v1100_v7 = vpop.f32.mrf.mxu1 }
 0x1cd   : > { %v1156_v8 = vadd.f32 %v1080_v6, %v843_v51  ;;  %v1164_v9 = vadd.f32 %v1100_v7, %v851_v2 }
 0x1ce   : > { %1203 = vst [vmem:[#allocation3 + $0x40] sm:$0xff] %v1171_v5 }
 0x1cf   : > { %1211 = vst [vmem:[#allocation3 + $0x10] sm:$0xff] %v1179_v52 }
 0x1d0   : > { %1188 = vst [vmem:[#allocation3 + $0x18] sm:$0xff] %v1156_v8 }
 0x1d1   : > { %1196 = vst [vmem:[#allocation3 + $0xb8] sm:$0xff] %v1164_v9 }
 0x1d3   : > { %v1120_v14 = vpop.f32.mrf.mxu2  ;;  %v1140_v15 = vpop.f32.mrf.mxu3 }
 0x1d4   : > { %v1172_v16 = vadd.f32 %v1120_v14, %v859_v10  ;;  %v1180_v17 = vadd.f32 %v1140_v15, %v867_v53  ;;  %v1083_v18 = vpop.f32.mrf.mxu0  ;;  %v1103_v19 = vpop.f32.mrf.mxu1 }
 0x1d5   : > { %v1157_v20 = vadd.f32 %v1083_v18, %v844_v11  ;;  %v1165_v21 = vadd.f32 %v1103_v19, %v852_v12 }
 0x1d6   : > { %1204 = vst [vmem:[#allocation3 + $0xc8] sm:$0xff] %v1172_v16 }
 0x1d7   : > { %1212 = vst [vmem:[#allocation3 + $0x28] sm:$0xff] %v1180_v17 }
 0x1d8   : > { %1189 = vst [vmem:[#allocation3 + $0x50] sm:$0xff] %v1157_v20 }
 0x1d9   : > { %1197 = vst [vmem:[#allocation3 + $0x60] sm:$0xff] %v1165_v21 }
 0x1db   : > { %v1123_v25 = vpop.f32.mrf.mxu2  ;;  %v1143_v26 = vpop.f32.mrf.mxu3 }
 0x1dc   : > { %v1173_v27 = vadd.f32 %v1123_v25, %v860_v22  ;;  %v1181_v28 = vadd.f32 %v1143_v26, %v868_v23  ;;  %v1085_v29 = vpop.f32.mrf.mxu0  ;;  %v1105_v30 = vpop.f32.mrf.mxu1 }
 0x1dd   : > { %v1158_v31 = vadd.f32 %v1085_v29, %v845_v0  ;;  %v1166_v32 = vadd.f32 %v1105_v30, %v853_v24 }
 0x1de   : > { %1205 = vst [vmem:[#allocation3 + $0xe0] sm:$0xff] %v1173_v27 }
 0x1df   : > { %1213 = vst [vmem:[#allocation3 + $0xa0] sm:$0xff] %v1181_v28 }
 0x1e0   : > { %1190 = vst [vmem:[#allocation3 + $0x68] sm:$0xff] %v1158_v31 }
 0x1e1   : > { %1198 = vst [vmem:[#allocation3 + $0xf0] sm:$0xff] %v1166_v32 }
 0x1e3   : > { %v1125_v13 = vpop.f32.mrf.mxu2  ;;  %v1145_v37 = vpop.f32.mrf.mxu3 }
 0x1e4   : > { %v1174_v38 = vadd.f32 %v1125_v13, %v861_v33  ;;  %v1182_v39 = vadd.f32 %v1145_v37, %v869_v34  ;;  %v1088_v40 = vpop.f32.mrf.mxu0  ;;  %v1108_v41 = vpop.f32.mrf.mxu1 }
 0x1e5   : > { %v1159_v42 = vadd.f32 %v1088_v40, %v846_v35  ;;  %v1167_v43 = vadd.f32 %v1108_v41, %v854_v36 }
 0x1e6   : > { %1206 = vst [vmem:[#allocation3 + $0x90] sm:$0xff] %v1174_v38 }
 0x1e7   : > { %1214 = vst [vmem:[#allocation3 + $0xf8] sm:$0xff] %v1182_v39 }
 0x1e8   : > { %1191 = vst [vmem:[#allocation3 + $0x30] sm:$0xff] %v1159_v42 }
 0x1e9   : > { %1199 = vst [vmem:[#allocation3 + $0x8] sm:$0xff] %v1167_v43 }
 0x1eb   : > { %v1128_v48 = vpop.f32.mrf.mxu2  ;;  %v1148_v49 = vpop.f32.mrf.mxu3 }
 0x1ec   : > { %v1175_v50 = vadd.f32 %v1128_v48, %v862_v44  ;;  %v1183_v54 = vadd.f32 %v1148_v49, %v870_v45  ;;  %v1090_v55 = vpop.f32.mrf.mxu0  ;;  %v1110_v56 = vpop.f32.mrf.mxu1 }
 0x1ed   : > { %v1160_v57 = vadd.f32 %v1090_v55, %v847_v46  ;;  %v1168_v58 = vadd.f32 %v1110_v56, %v855_v47 }
 0x1ee   : > { %1207 = vst [vmem:[#allocation3 + $0x70] sm:$0xff] %v1175_v50 }
 0x1ef   : > { %1215 = vst [vmem:[#allocation3 + $0x20] sm:$0xff] %v1183_v54 }
 0x1f0   : > { %1192 = vst [vmem:[#allocation3 + $0x48] sm:$0xff] %v1160_v57 }
 0x1f1   : > { %1200 = vst [vmem:[#allocation3 + $0x78] sm:$0xff] %v1168_v58 }
 0x1f3   : > { %v1130_v61 = vpop.f32.mrf.mxu2  ;;  %v1150_v62 = vpop.f32.mrf.mxu3  ;;  %1220 = sbr.rel (%p2115_p7) target bundleno = 834 (0x342), region = 102 }
 0x1f4   : > { %v1176_v63 = vadd.f32 %v1130_v61, %v863_v59  ;;  %v1184_v1 = vadd.f32 %v1150_v62, %v871_v60 }
 0x1f6   : > { %1208 = vst [vmem:[#allocation3 + $0xc0] sm:$0xff] %v1176_v63 }
 0x1f7   : > { %1216 = vst [vmem:[#allocation3 + $0x98] sm:$0xff] %v1184_v1 }
 0x1f8   : > { %v1257_v51 = vld [vmem:[%s2850_s14 + $0x20] sm:$0xff]  ;;  %v1255_v2 = vld [vmem:[%s2850_s14 + $0x10] sm:$0xff]  ;;  %v2730_v4 = vmov 0   ;;  %v1258_v5 = vld [vmem:[%s2850_s14 + $0x28] sm:$0xff]  ;;  %s1550_s18 = sshra.s32 (!%p2118_p8), %s3074_s17, 3  ;;  %s3207_s5 = scalar_lea.vmem (!%p2118_p8), [#allocation7], %s3074_s17 }
 0x1f9   : > { %v1253_v3 = vld [vmem:[%s2850_s14] sm:$0xff]  ;;  %2620 = vset.pattern.permute.xlu2 %v2730_v4  ;;  %2619 = vset.pattern.permute.xlu1 %v2730_v4  ;;  %v1256_v52 = vld [vmem:[%s2850_s14 + $0x18] sm:$0xff]  ;;  %v1254_v6 = vld [vmem:[%s2850_s14 + $0x8] sm:$0xff]  ;;  %s2119_s12 = sshll.u32 (!%p2118_p8), %s1550_s18, 2 }
 0x1fa   : > { %2618 = vset.pattern.permute.xlu0 %v2730_v4  ;;  %1307 = vperm.xlu2 %2620, %v1257_v51   ;;  %v1261_v7 = vld [vmem:[%s2850_s14 + $0x40] sm:$0xff]  ;;  %v1260_v8 = vld [vmem:[%s2850_s14 + $0x38] sm:$0xff]  ;;  %v1259_v9 = vld [vmem:[%s2850_s14 + $0x30] sm:$0xff]  ;;  %s3194_s13 = scalar_lea.vmem (!%p2118_p8), [#allocation2], %s2119_s12 }
 0x1fb   : > { %1297 = vperm.xlu1 %2619, %v1255_v2   ;;  %1287 = vperm.xlu0 %2618, %v1253_v3   ;;  %v1264_v10 = vld [vmem:[%s2850_s14 + $0x58] sm:$0xff]  ;;  %v1263_v53 = vld [vmem:[%s2850_s14 + $0x50] sm:$0xff]  ;;  %v1262_v11 = vld [vmem:[%s2850_s14 + $0x48] sm:$0xff] }
 0x1fc   : > { %v1267_v12 = vld [vmem:[%s2850_s14 + $0x70] sm:$0xff]  ;;  %v1266_v14 = vld [vmem:[%s2850_s14 + $0x68] sm:$0xff]  ;;  %v1265_v15 = vld [vmem:[%s2850_s14 + $0x60] sm:$0xff] }
 0x1fd   : > { %v1270_v16 = vld [vmem:[%s2850_s14 + $0x88] sm:$0xff]  ;;  %v1269_v17 = vld [vmem:[%s2850_s14 + $0x80] sm:$0xff]  ;;  %v1268_v18 = vld [vmem:[%s2850_s14 + $0x78] sm:$0xff] }
 0x1fe   : > { %v1273_v19 = vld [vmem:[%s2850_s14 + $0xa0] sm:$0xff]  ;;  %v1272_v20 = vld [vmem:[%s2850_s14 + $0x98] sm:$0xff]  ;;  %v1271_v21 = vld [vmem:[%s2850_s14 + $0x90] sm:$0xff] }
 0x1ff   : > { %v1276_v22 = vld [vmem:[%s2850_s14 + $0xb8] sm:$0xff]  ;;  %v1275_v23 = vld [vmem:[%s2850_s14 + $0xb0] sm:$0xff]  ;;  %v1274_v0 = vld [vmem:[%s2850_s14 + $0xa8] sm:$0xff] }
 0x200   : > { %v1279_v24 = vld [vmem:[%s2850_s14 + $0xd0] sm:$0xff]  ;;  %v1278_v25 = vld [vmem:[%s2850_s14 + $0xc8] sm:$0xff]  ;;  %v1277_v26 = vld [vmem:[%s2850_s14 + $0xc0] sm:$0xff] }
 0x201   : > { %v1282_v27 = vld [vmem:[%s2850_s14 + $0xe8] sm:$0xff]  ;;  %v1281_v28 = vld [vmem:[%s2850_s14 + $0xe0] sm:$0xff]  ;;  %v1280_v29 = vld [vmem:[%s2850_s14 + $0xd8] sm:$0xff] }
 0x202   : > { %1312 = vperm.xlu2 %2620, %v1258_v5   ;;  %v1284_v30 = vld [vmem:[%s2850_s14 + $0xf8] sm:$0xff]  ;;  %v1283_v31 = vld [vmem:[%s2850_s14 + $0xf0] sm:$0xff]  ;;  %v1226_v34 = vld [vmem:[#allocation3 + $0x68] sm:$0xff]  ;;  %s3084_s14 = scalar_lea.vmem [#allocation2], %s2117_s7 }
 0x203   : > { %1302 = vperm.xlu1 %2619, %v1256_v52   ;;  %1292 = vperm.xlu0 %2618, %v1254_v6   ;;  %v1225_v33 = vld [vmem:[#allocation3 + $0x50] sm:$0xff]  ;;  %v1223_v41 = vld [vmem:[#allocation3 + $0xd8] sm:$0xff]  ;;  %v1222_v44 = vld [vmem:[#allocation3] sm:$0xff] }
 0x204   : > { %v1221_v42 = vld [vmem:[#allocation3 + $0xb0] sm:$0xff]  ;;  %v1224_v43 = vld [vmem:[#allocation3 + $0x18] sm:$0xff]  ;;  %v1228_v57 = vld [vmem:[#allocation3 + $0x48] sm:$0xff] }
 0x205   : > { %v1227_v58 = vld [vmem:[#allocation3 + $0x30] sm:$0xff]  ;;  %v1229_v51 = vld [vmem:[#allocation3 + $0x80] sm:$0xff]  ;;  %v1232_v2 = vld [vmem:[#allocation3 + $0xb8] sm:$0xff] }
 0x206   : > { %v1231_v3 = vld [vmem:[#allocation3 + $0xe8] sm:$0xff] }
 0x207   : > { %v1230_v4 = vld [vmem:[#allocation3 + $0x88] sm:$0xff] }
 0x20a   : > { %1327 = vperm.xlu2 %2620, %v1261_v7  }
 0x20b   : > { %1322 = vperm.xlu1 %2619, %v1260_v8   ;;  %1317 = vperm.xlu0 %2618, %v1259_v9  }
 0x212   : > { %1342 = vperm.xlu2 %2620, %v1264_v10  }
 0x213   : > { %1337 = vperm.xlu1 %2619, %v1263_v53   ;;  %1332 = vperm.xlu0 %2618, %v1262_v11  }
 0x21a   : > { %1357 = vperm.xlu2 %2620, %v1267_v12   ;;  %v1234_v12 = vld [vmem:[#allocation3 + $0xf0] sm:$0xff] }
 0x21b   : > { %1352 = vperm.xlu1 %2619, %v1266_v14   ;;  %1347 = vperm.xlu0 %2618, %v1265_v15   ;;  %v1233_v14 = vld [vmem:[#allocation3 + $0x60] sm:$0xff] }
 0x222   : > { %1372 = vperm.xlu2 %2620, %v1270_v16  }
 0x223   : > { %1367 = vperm.xlu1 %2619, %v1269_v17   ;;  %1362 = vperm.xlu0 %2618, %v1268_v18  }
 0x22a   : > { %1387 = vperm.xlu2 %2620, %v1273_v19  }
 0x22b   : > { %1382 = vperm.xlu1 %2619, %v1272_v20   ;;  %1377 = vperm.xlu0 %2618, %v1271_v21   ;;  %v1235_v20 = vld [vmem:[#allocation3 + $0x8] sm:$0xff]  ;;  %v1238_v21 = vld [vmem:[#allocation3 + $0x58] sm:$0xff] }
 0x232   : > { %1402 = vperm.xlu2 %2620, %v1276_v22   ;;  %v1237_v22 = vld [vmem:[#allocation3 + $0x38] sm:$0xff] }
 0x233   : > { %1397 = vperm.xlu1 %2619, %v1275_v23   ;;  %1392 = vperm.xlu0 %2618, %v1274_v0   ;;  %v1236_v23 = vld [vmem:[#allocation3 + $0x78] sm:$0xff] }
 0x23a   : > { %1417 = vperm.xlu2 %2620, %v1279_v24  }
 0x23b   : > { %1412 = vperm.xlu1 %2619, %v1278_v25   ;;  %1407 = vperm.xlu0 %2618, %v1277_v26  }
 0x242   : > { %1432 = vperm.xlu2 %2620, %v1282_v27  }
 0x243   : > { %1427 = vperm.xlu1 %2619, %v1281_v28   ;;  %1422 = vperm.xlu0 %2618, %v1280_v29  }
 0x24b   : > { %1442 = vperm.xlu1 %2619, %v1284_v30   ;;  %1437 = vperm.xlu0 %2618, %v1283_v31  }
 0x254   : > { %v1308_v32 = vpop.permute.xlu2 %1307 }
 0x255   : > { %v3078_v35 = vmul.f32 %v1308_v32, %v1225_v33  ;;  %v1240_v32 = vld [vmem:[#allocation3 + $0xc8] sm:$0xff]  ;;  %v1239_v33 = vld [vmem:[#allocation3 + $0x40] sm:$0xff] }
 0x25c   : > { %v1313_v36 = vpop.permute.xlu2 %1312 }
 0x25d   : > { %v3080_v13 = vmul.f32 %v1313_v36, %v1226_v34 }
 0x25f   : > { %v2316_v37 = vpack.c.bf16 %v3080_v13, %v3078_v35 }
 0x261   : > { %2477 = vst [vmem:[%s3084_s14 + $0x10] sm:$0xff] %v2316_v37  }
 0x264   : > { %v1328_v38 = vpop.permute.xlu2 %1327 }
 0x265   : > { %v3108_v6 = vmul.f32 %v1328_v38, %v1229_v51 }
 0x26c   : > { %v1343_v47 = vpop.permute.xlu2 %1342 }
 0x26d   : > { %v1298_v39 = vpop.permute.xlu1 %1297  ;;  %v1288_v40 = vpop.permute.xlu0 %1287  ;;  %v3110_v7 = vmul.f32 %v1343_v47, %v1232_v2 }
 0x26e   : > { %v3087_v48 = vmul.f32 %v1298_v39, %v1223_v41  ;;  %v3089_v49 = vmul.f32 %v1288_v40, %v1221_v42  ;;  %v1241_v41 = vld [vmem:[#allocation3 + $0xe0] sm:$0xff] }
 0x26f   : > { %v1244_v42 = vld [vmem:[#allocation3 + $0xc0] sm:$0xff] }
 0x274   : > { %v1358_v63 = vpop.permute.xlu2 %1357 }
 0x275   : > { %v1303_v45 = vpop.permute.xlu1 %1302  ;;  %v1293_v46 = vpop.permute.xlu0 %1292  ;;  %v3129_v26 = vmul.f32 %v1358_v63, %v1235_v20  ;;  %v1246_v63 = vld [vmem:[#allocation3 + $0xd0] sm:$0xff] }
 0x276   : > { %v3091_v50 = vmul.f32 %v1303_v45, %v1224_v43  ;;  %v3093_v54 = vmul.f32 %v1293_v46, %v1222_v44  ;;  %v1243_v43 = vld [vmem:[#allocation3 + $0x70] sm:$0xff] }
 0x277   : > { %v1242_v44 = vld [vmem:[#allocation3 + $0x90] sm:$0xff] }
 0x278   : > { %v2311_v55 = vpack.c.bf16 %v3091_v50, %v3087_v48  ;;  %v2306_v56 = vpack.c.bf16 %v3093_v54, %v3089_v49 }
 0x27a   : > { %2476 = vst [vmem:[%s3084_s14 + $0x8] sm:$0xff] %v2311_v55  }
 0x27b   : > { %2307 = vst [vmem:[%s3084_s14] sm:$0xff] %v2306_v56  }
 0x27c   : > { %v1373_v11 = vpop.permute.xlu2 %1372 }
 0x27d   : > { %v1323_v59 = vpop.permute.xlu1 %1322  ;;  %v1318_v60 = vpop.permute.xlu0 %1317  ;;  %v3131_v27 = vmul.f32 %v1373_v11, %v1238_v21  ;;  %v1249_v11 = vld [vmem:[#allocation3 + $0xa0] sm:$0xff] }
 0x27e   : > { %v3101_v61 = vmul.f32 %v1323_v59, %v1228_v57  ;;  %v3103_v62 = vmul.f32 %v1318_v60, %v1227_v58 }
 0x280   : > { %v2321_v1 = vpack.c.bf16 %v3101_v61, %v3103_v62 }
 0x282   : > { %2478 = vst [vmem:[%s3084_s14 + $0x18] sm:$0xff] %v2321_v1   ;;  %v1245_v1 = vld [vmem:[#allocation3 + $0xa8] sm:$0xff] }
 0x284   : > { %v1388_v0 = vpop.permute.xlu2 %1387 }
 0x285   : > { %v1338_v5 = vpop.permute.xlu1 %1337  ;;  %v1333_v52 = vpop.permute.xlu0 %1332  ;;  %v3150_v47 = vmul.f32 %v1388_v0, %v1241_v41  ;;  %v1252_v0 = vld [vmem:[#allocation3 + $0x98] sm:$0xff] }
 0x286   : > { %v3112_v8 = vmul.f32 %v1338_v5, %v1231_v3  ;;  %v3114_v9 = vmul.f32 %v1333_v52, %v1230_v4  ;;  %v1247_v52 = vld [vmem:[#allocation3 + $0x10] sm:$0xff] }
 0x288   : > { %v2331_v10 = vpack.c.bf16 %v3110_v7, %v3112_v8  ;;  %v2326_v53 = vpack.c.bf16 %v3114_v9, %v3108_v6 }
 0x28a   : > { %2480 = vst [vmem:[%s3084_s14 + $0x28] sm:$0xff] %v2331_v10  }
 0x28b   : > { %2479 = vst [vmem:[%s3084_s14 + $0x20] sm:$0xff] %v2326_v53   ;;  %v1250_v53 = vld [vmem:[#allocation3 + $0xf8] sm:$0xff] }
 0x28c   : > { %v1403_v39 = vpop.permute.xlu2 %1402 }
 0x28d   : > { %v1353_v15 = vpop.permute.xlu1 %1352  ;;  %v1348_v16 = vpop.permute.xlu0 %1347  ;;  %v3152_v55 = vmul.f32 %v1403_v39, %v1244_v42 }
 0x28e   : > { %v3122_v17 = vmul.f32 %v1353_v15, %v1234_v12  ;;  %v3124_v18 = vmul.f32 %v1348_v16, %v1233_v14  ;;  %v1248_v12 = vld [vmem:[#allocation3 + $0x28] sm:$0xff] }
 0x290   : > { %v2336_v19 = vpack.c.bf16 %v3122_v17, %v3124_v18 }
 0x292   : > { %2481 = vst [vmem:[%s3084_s14 + $0x30] sm:$0xff] %v2336_v19  }
 0x294   : > { %v1418_v60 = vpop.permute.xlu2 %1417 }
 0x295   : > { %v1368_v24 = vpop.permute.xlu1 %1367  ;;  %v1363_v25 = vpop.permute.xlu0 %1362  ;;  %v3171_v16 = vmul.f32 %v1418_v60, %v1247_v52 }
 0x296   : > { %v3133_v28 = vmul.f32 %v1368_v24, %v1237_v22  ;;  %v3135_v29 = vmul.f32 %v1363_v25, %v1236_v23  ;;  %v1251_v24 = vld [vmem:[#allocation3 + $0x20] sm:$0xff] }
 0x298   : > { %v2346_v30 = vpack.c.bf16 %v3131_v27, %v3133_v28  ;;  %v2341_v31 = vpack.c.bf16 %v3135_v29, %v3129_v26 }
 0x29a   : > { %2483 = vst [vmem:[%s3084_s14 + $0x40] sm:$0xff] %v2346_v30  }
 0x29b   : > { %2482 = vst [vmem:[%s3084_s14 + $0x38] sm:$0xff] %v2341_v31  }
 0x29c   : > { %v1433_v10 = vpop.permute.xlu2 %1432 }
 0x29d   : > { %v1383_v34 = vpop.permute.xlu1 %1382  ;;  %v1378_v36 = vpop.permute.xlu0 %1377  ;;  %v3173_v19 = vmul.f32 %v1433_v10, %v1250_v53 }
 0x29e   : > { %v3143_v37 = vmul.f32 %v1383_v34, %v1240_v32  ;;  %v3145_v38 = vmul.f32 %v1378_v36, %v1239_v33 }
 0x2a0   : > { %v2351_v40 = vpack.c.bf16 %v3143_v37, %v3145_v38 }
 0x2a2   : > { %2484 = vst [vmem:[%s3084_s14 + $0x48] sm:$0xff] %v2351_v40  }
 0x2a5   : > { %v1398_v45 = vpop.permute.xlu1 %1397  ;;  %v1393_v46 = vpop.permute.xlu0 %1392 }
 0x2a6   : > { %v3154_v56 = vmul.f32 %v1398_v45, %v1243_v43  ;;  %v3156_v57 = vmul.f32 %v1393_v46, %v1242_v44 }
 0x2a8   : > { %v2361_v58 = vpack.c.bf16 %v3152_v55, %v3154_v56  ;;  %v2356_v59 = vpack.c.bf16 %v3156_v57, %v3150_v47 }
 0x2aa   : > { %2486 = vst [vmem:[%s3084_s14 + $0x58] sm:$0xff] %v2361_v58  }
 0x2ab   : > { %2485 = vst [vmem:[%s3084_s14 + $0x50] sm:$0xff] %v2356_v59  }
 0x2ad   : > { %v1413_v51 = vpop.permute.xlu1 %1412  ;;  %v1408_v2 = vpop.permute.xlu0 %1407 }
 0x2ae   : > { %v3164_v3 = vmul.f32 %v1413_v51, %v1246_v63  ;;  %v3166_v4 = vmul.f32 %v1408_v2, %v1245_v1 }
 0x2b0   : > { %v2366_v5 = vpack.c.bf16 %v3164_v3, %v3166_v4 }
 0x2b2   : > { %2487 = vst [vmem:[%s3084_s14 + $0x60] sm:$0xff] %v2366_v5  }
 0x2b5   : > { %v1428_v14 = vpop.permute.xlu1 %1427  ;;  %v1423_v15 = vpop.permute.xlu0 %1422 }
 0x2b6   : > { %v3175_v20 = vmul.f32 %v1428_v14, %v1249_v11  ;;  %v3177_v21 = vmul.f32 %v1423_v15, %v1248_v12 }
 0x2b8   : > { %v2376_v22 = vpack.c.bf16 %v3173_v19, %v3175_v20  ;;  %v2371_v23 = vpack.c.bf16 %v3177_v21, %v3171_v16 }
 0x2ba   : > { %2489 = vst [vmem:[%s3084_s14 + $0x70] sm:$0xff] %v2376_v22  }
 0x2bb   : > { %2488 = vst [vmem:[%s3084_s14 + $0x68] sm:$0xff] %v2371_v23  }
 0x2bd   : > { %v1443_v25 = vpop.permute.xlu1 %1442  ;;  %v1438_v30 = vpop.permute.xlu0 %1437 }
 0x2be   : > { %v3185_v31 = vmul.f32 %v1443_v25, %v1252_v0  ;;  %v3187_v32 = vmul.f32 %v1438_v30, %v1251_v24  ;;  %1549 = sbr.rel (%p2118_p8) target bundleno = 750 (0x2ee), region = 106 }
 0x2c0   : > { %v2381_v33 = vpack.c.bf16 %v3185_v31, %v3187_v32 }
 0x2c2   : > { %2490 = vst [vmem:[%s3084_s14 + $0x78] sm:$0xff] %v2381_v33  }
 0x2c9   : > { %v2384_v34 = vld [vmem:[%s3194_s13] sm:$0xff]   ;;  %v2491_v36 = vld [vmem:[%s3194_s13 + $0x8] sm:$0xff]   ;;  %v2492_v39 = vld [vmem:[%s3194_s13 + $0x10] sm:$0xff]  }
 0x2ca   : > { %v2385_v40 = vunpack.c.l.bf16 %v2384_v34  ;;  %v2386_v41 = vunpack.c.h.bf16 %v2384_v34  ;;  %v2389_v42 = vunpack.c.l.bf16 %v2491_v36  ;;  %v2390_v43 = vunpack.c.h.bf16 %v2491_v36  ;;  %v2493_v44 = vld [vmem:[%s3194_s13 + $0x18] sm:$0xff]   ;;  %v2494_v58 = vld [vmem:[%s3194_s13 + $0x20] sm:$0xff]   ;;  %v2495_v5 = vld [vmem:[%s3194_s13 + $0x28] sm:$0xff]  }
 0x2cb   : > { %v2393_v45 = vunpack.c.l.bf16 %v2492_v39  ;;  %v2394_v46 = vunpack.c.h.bf16 %v2492_v39  ;;  %v2397_v1 = vunpack.c.l.bf16 %v2493_v44  ;;  %v2398_v2 = vunpack.c.h.bf16 %v2493_v44  ;;  %v2496_v12 = vld [vmem:[%s3194_s13 + $0x30] sm:$0xff]   ;;  %v2497_v0 = vld [vmem:[%s3194_s13 + $0x38] sm:$0xff]   ;;  %v2498_v34 = vld [vmem:[%s3194_s13 + $0x40] sm:$0xff]  }
 0x2cc   : > { %v1618_v59 = vadd.f32 %v2385_v40, %v3089_v49  ;;  %v1619_v60 = vadd.f32 %v2386_v41, %v3093_v54  ;;  %v1620_v63 = vadd.f32 %v2389_v42, %v3087_v48  ;;  %v1621_v51 = vadd.f32 %v2390_v43, %v3091_v50  ;;  %v2499_v42 = vld [vmem:[%s3194_s13 + $0x48] sm:$0xff]  }
 0x2cd   : > { %v1622_v52 = vadd.f32 %v2393_v45, %v3078_v35  ;;  %v2401_v10 = vunpack.c.l.bf16 %v2494_v58  ;;  %v1623_v53 = vadd.f32 %v2394_v46, %v3080_v13  ;;  %v2402_v11 = vunpack.c.h.bf16 %v2494_v58  ;;  %v2500_v58 = vld [vmem:[%s3194_s13 + $0x50] sm:$0xff]  }
 0x2ce   : > { %1651 = vst [vmem:[%s3207_s5] sm:$0xff] %v1618_v59  ;;  %v1624_v14 = vadd.f32 %v2397_v1, %v3103_v62  ;;  %v2405_v15 = vunpack.c.l.bf16 %v2495_v5  ;;  %v1625_v22 = vadd.f32 %v2398_v2, %v3101_v61  ;;  %v2406_v23 = vunpack.c.h.bf16 %v2495_v5 }
 0x2cf   : > { %1652 = vst [vmem:[%s3207_s5 + $0x8] sm:$0xff] %v1619_v60  ;;  %v1626_v24 = vadd.f32 %v2401_v10, %v3108_v6  ;;  %v2409_v25 = vunpack.c.l.bf16 %v2496_v12  ;;  %v1627_v30 = vadd.f32 %v2402_v11, %v3114_v9  ;;  %v2410_v33 = vunpack.c.h.bf16 %v2496_v12 }
 0x2d0   : > { %1653 = vst [vmem:[%s3207_s5 + $0x10] sm:$0xff] %v1620_v63  ;;  %v1628_v36 = vadd.f32 %v2405_v15, %v3112_v8  ;;  %v2413_v39 = vunpack.c.l.bf16 %v2497_v0  ;;  %v1629_v40 = vadd.f32 %v2406_v23, %v3110_v7  ;;  %v2414_v41 = vunpack.c.h.bf16 %v2497_v0 }
 0x2d1   : > { %1654 = vst [vmem:[%s3207_s5 + $0x18] sm:$0xff] %v1621_v51  ;;  %v1630_v43 = vadd.f32 %v2409_v25, %v3124_v18  ;;  %v2417_v44 = vunpack.c.l.bf16 %v2498_v34  ;;  %v1631_v45 = vadd.f32 %v2410_v33, %v3122_v17  ;;  %v2418_v46 = vunpack.c.h.bf16 %v2498_v34  ;;  %v2501_v51 = vld [vmem:[%s3194_s13 + $0x58] sm:$0xff]  }
 0x2d2   : > { %1655 = vst [vmem:[%s3207_s5 + $0x20] sm:$0xff] %v1622_v52  ;;  %v1632_v59 = vadd.f32 %v2413_v39, %v3129_v26  ;;  %v2421_v60 = vunpack.c.l.bf16 %v2499_v42  ;;  %v1633_v63 = vadd.f32 %v2414_v41, %v3135_v29  ;;  %v2422_v1 = vunpack.c.h.bf16 %v2499_v42 }
 0x2d3   : > { %1656 = vst [vmem:[%s3207_s5 + $0x28] sm:$0xff] %v1623_v53  ;;  %v1634_v2 = vadd.f32 %v2417_v44, %v3133_v28  ;;  %v2425_v5 = vunpack.c.l.bf16 %v2500_v58  ;;  %v1635_v52 = vadd.f32 %v2418_v46, %v3131_v27  ;;  %v2426_v10 = vunpack.c.h.bf16 %v2500_v58  ;;  %v2502_v53 = vld [vmem:[%s3194_s13 + $0x60] sm:$0xff]  }
 0x2d4   : > { %1657 = vst [vmem:[%s3207_s5 + $0x30] sm:$0xff] %v1624_v14  ;;  %v1636_v11 = vadd.f32 %v2421_v60, %v3145_v38  ;;  %v2429_v12 = vunpack.c.l.bf16 %v2501_v51  ;;  %v1637_v14 = vadd.f32 %v2422_v1, %v3143_v37  ;;  %v2430_v15 = vunpack.c.h.bf16 %v2501_v51 }
 0x2d5   : > { %1658 = vst [vmem:[%s3207_s5 + $0x38] sm:$0xff] %v1625_v22  ;;  %v2503_v22 = vld [vmem:[%s3194_s13 + $0x68] sm:$0xff]   ;;  %v1638_v23 = vadd.f32 %v2425_v5, %v3150_v47  ;;  %v2433_v0 = vunpack.c.l.bf16 %v2502_v53  ;;  %v2434_v25 = vunpack.c.h.bf16 %v2502_v53 }
 0x2d6   : > { %1659 = vst [vmem:[%s3207_s5 + $0x40] sm:$0xff] %v1626_v24  ;;  %v1639_v24 = vadd.f32 %v2426_v10, %v3156_v57  ;;  %v1640_v33 = vadd.f32 %v2429_v12, %v3154_v56  ;;  %v2437_v34 = vunpack.c.l.bf16 %v2503_v22  ;;  %v2438_v39 = vunpack.c.h.bf16 %v2503_v22 }
 0x2d7   : > { %1660 = vst [vmem:[%s3207_s5 + $0x48] sm:$0xff] %v1627_v30  ;;  %v2504_v30 = vld [vmem:[%s3194_s13 + $0x70] sm:$0xff]   ;;  %v1642_v41 = vadd.f32 %v2433_v0, %v3166_v4 }
 0x2d8   : > { %1661 = vst [vmem:[%s3207_s5 + $0x50] sm:$0xff] %v1628_v36  ;;  %v1641_v36 = vadd.f32 %v2430_v15, %v3152_v55  ;;  %v2441_v42 = vunpack.c.l.bf16 %v2504_v30  ;;  %v2442_v44 = vunpack.c.h.bf16 %v2504_v30  ;;  %v1645_v58 = vadd.f32 %v2438_v39, %v3177_v21 }
 0x2d9   : > { %1662 = vst [vmem:[%s3207_s5 + $0x58] sm:$0xff] %v1629_v40  ;;  %v2505_v40 = vld [vmem:[%s3194_s13 + $0x78] sm:$0xff]  }
 0x2da   : > { %1663 = vst [vmem:[%s3207_s5 + $0x60] sm:$0xff] %v1630_v43  ;;  %v1643_v43 = vadd.f32 %v2434_v25, %v3164_v3  ;;  %v2445_v46 = vunpack.c.l.bf16 %v2505_v40  ;;  %v1646_v60 = vadd.f32 %v2441_v42, %v3175_v20 }
 0x2db   : > { %1664 = vst [vmem:[%s3207_s5 + $0x68] sm:$0xff] %v1631_v45  ;;  %v1644_v45 = vadd.f32 %v2437_v34, %v3171_v16 }
 0x2dc   : > { %1665 = vst [vmem:[%s3207_s5 + $0x70] sm:$0xff] %v1632_v59  ;;  %v2446_v59 = vunpack.c.h.bf16 %v2505_v40  ;;  %v1648_v1 = vadd.f32 %v2445_v46, %v3187_v32 }
 0x2dd   : > { %1666 = vst [vmem:[%s3207_s5 + $0x78] sm:$0xff] %v1633_v63  ;;  %v1647_v63 = vadd.f32 %v2442_v44, %v3173_v19 }
 0x2de   : > { %1667 = vst [vmem:[%s3207_s5 + $0x80] sm:$0xff] %v1634_v2  ;;  %v1649_v51 = vadd.f32 %v2446_v59, %v3185_v31 }
 0x2df   : > { %1668 = vst [vmem:[%s3207_s5 + $0x88] sm:$0xff] %v1635_v52 }
 0x2e0   : > { %1669 = vst [vmem:[%s3207_s5 + $0x90] sm:$0xff] %v1636_v11 }
 0x2e1   : > { %1670 = vst [vmem:[%s3207_s5 + $0x98] sm:$0xff] %v1637_v14 }
 0x2e2   : > { %1671 = vst [vmem:[%s3207_s5 + $0xa0] sm:$0xff] %v1638_v23 }
 0x2e3   : > { %1672 = vst [vmem:[%s3207_s5 + $0xa8] sm:$0xff] %v1639_v24 }
 0x2e4   : > { %1673 = vst [vmem:[%s3207_s5 + $0xb0] sm:$0xff] %v1640_v33 }
 0x2e5   : > { %1674 = vst [vmem:[%s3207_s5 + $0xb8] sm:$0xff] %v1641_v36 }
 0x2e6   : > { %1675 = vst [vmem:[%s3207_s5 + $0xc0] sm:$0xff] %v1642_v41 }
 0x2e7   : > { %1676 = vst [vmem:[%s3207_s5 + $0xc8] sm:$0xff] %v1643_v43 }
 0x2e8   : > { %1677 = vst [vmem:[%s3207_s5 + $0xd0] sm:$0xff] %v1644_v45 }
 0x2e9   : > { %1678 = vst [vmem:[%s3207_s5 + $0xd8] sm:$0xff] %v1645_v58 }
 0x2ea   : > { %1679 = vst [vmem:[%s3207_s5 + $0xe0] sm:$0xff] %v1646_v60 }
 0x2eb   : > { %1680 = vst [vmem:[%s3207_s5 + $0xe8] sm:$0xff] %v1647_v63 }
 0x2ec   : > { %1681 = vst [vmem:[%s3207_s5 + $0xf0] sm:$0xff] %v1648_v1 }
 0x2ed   : > { %1682 = vst [vmem:[%s3207_s5 + $0xf8] sm:$0xff] %v1649_v51 }
 0x2ee PF: > { %p2120_p9 = scmp.le.s32.totalorder %s2709_s19, 0 }
 0x2ef   : > { %s3281_s15 = scalar_lea.vmem (!%p2120_p9), [#allocation7], %s3074_s17 }
 0x2f0   : > { %1686 = sbr.rel (%p2120_p9) target bundleno = 792 (0x318), region = 110 }
 0x2f5   : > { %v1688_v2 = vld [vmem:[%s3281_s15] sm:$0xff]  ;;  %v1689_v5 = vld [vmem:[%s3281_s15 + $0x8] sm:$0xff]  ;;  %v1690_v52 = vld [vmem:[%s3281_s15 + $0x10] sm:$0xff] }
 0x2f6   : > { %v1720_v10 = vadd.f32 %v1688_v2, %v3089_v49  ;;  %v1721_v53 = vadd.f32 %v1689_v5, %v3093_v54  ;;  %v1722_v11 = vadd.f32 %v1690_v52, %v3087_v48  ;;  %v1691_v12 = vld [vmem:[%s3281_s15 + $0x18] sm:$0xff]  ;;  %v1692_v14 = vld [vmem:[%s3281_s15 + $0x20] sm:$0xff]  ;;  %v1693_v15 = vld [vmem:[%s3281_s15 + $0x28] sm:$0xff] }
 0x2f7   : > { %v1723_v22 = vadd.f32 %v1691_v12, %v3091_v50  ;;  %v1694_v23 = vld [vmem:[%s3281_s15 + $0x30] sm:$0xff]  ;;  %v1724_v0 = vadd.f32 %v1692_v14, %v3078_v35  ;;  %v1695_v49 = vld [vmem:[%s3281_s15 + $0x38] sm:$0xff]  ;;  %v1725_v54 = vadd.f32 %v1693_v15, %v3080_v13  ;;  %v1696_v48 = vld [vmem:[%s3281_s15 + $0x40] sm:$0xff] }
 0x2f8   : > { %1752 = vst [vmem:[%s3281_s15] sm:$0xff] %v1720_v10  ;;  %v1726_v24 = vadd.f32 %v1694_v23, %v3103_v62  ;;  %v1697_v50 = vld [vmem:[%s3281_s15 + $0x48] sm:$0xff]  ;;  %v1727_v25 = vadd.f32 %v1695_v49, %v3101_v61  ;;  %v1698_v35 = vld [vmem:[%s3281_s15 + $0x50] sm:$0xff]  ;;  %v1728_v30 = vadd.f32 %v1696_v48, %v3108_v6  ;;  %v1699_v13 = vld [vmem:[%s3281_s15 + $0x58] sm:$0xff] }
 0x2f9   : > { %1753 = vst [vmem:[%s3281_s15 + $0x8] sm:$0xff] %v1721_v53  ;;  %v1729_v33 = vadd.f32 %v1697_v50, %v3114_v9  ;;  %v1700_v62 = vld [vmem:[%s3281_s15 + $0x60] sm:$0xff]  ;;  %v1730_v34 = vadd.f32 %v1698_v35, %v3112_v8  ;;  %v1701_v61 = vld [vmem:[%s3281_s15 + $0x68] sm:$0xff]  ;;  %v1731_v36 = vadd.f32 %v1699_v13, %v3110_v7  ;;  %v1702_v6 = vld [vmem:[%s3281_s15 + $0x70] sm:$0xff] }
 0x2fa   : > { %1754 = vst [vmem:[%s3281_s15 + $0x10] sm:$0xff] %v1722_v11  ;;  %v1732_v39 = vadd.f32 %v1700_v62, %v3124_v18  ;;  %v1703_v9 = vld [vmem:[%s3281_s15 + $0x78] sm:$0xff]  ;;  %v1733_v40 = vadd.f32 %v1701_v61, %v3122_v17  ;;  %v1704_v8 = vld [vmem:[%s3281_s15 + $0x80] sm:$0xff]  ;;  %v1734_v41 = vadd.f32 %v1702_v6, %v3129_v26  ;;  %v1705_v7 = vld [vmem:[%s3281_s15 + $0x88] sm:$0xff] }
 0x2fb   : > { %1755 = vst [vmem:[%s3281_s15 + $0x18] sm:$0xff] %v1723_v22  ;;  %v1735_v42 = vadd.f32 %v1703_v9, %v3135_v29  ;;  %v1706_v18 = vld [vmem:[%s3281_s15 + $0x90] sm:$0xff]  ;;  %v1736_v43 = vadd.f32 %v1704_v8, %v3133_v28  ;;  %v1707_v17 = vld [vmem:[%s3281_s15 + $0x98] sm:$0xff]  ;;  %v1737_v44 = vadd.f32 %v1705_v7, %v3131_v27  ;;  %v1708_v26 = vld [vmem:[%s3281_s15 + $0xa0] sm:$0xff] }
 0x2fc   : > { %1756 = vst [vmem:[%s3281_s15 + $0x20] sm:$0xff] %v1724_v0  ;;  %v1738_v45 = vadd.f32 %v1706_v18, %v3145_v38  ;;  %v1709_v29 = vld [vmem:[%s3281_s15 + $0xa8] sm:$0xff]  ;;  %v1739_v46 = vadd.f32 %v1707_v17, %v3143_v37  ;;  %v1710_v28 = vld [vmem:[%s3281_s15 + $0xb0] sm:$0xff]  ;;  %v1740_v58 = vadd.f32 %v1708_v26, %v3150_v47  ;;  %v1711_v27 = vld [vmem:[%s3281_s15 + $0xb8] sm:$0xff] }
 0x2fd   : > { %1757 = vst [vmem:[%s3281_s15 + $0x28] sm:$0xff] %v1725_v54  ;;  %v1741_v59 = vadd.f32 %v1709_v29, %v3156_v57  ;;  %v1712_v38 = vld [vmem:[%s3281_s15 + $0xc0] sm:$0xff]  ;;  %v1742_v60 = vadd.f32 %v1710_v28, %v3154_v56  ;;  %v1713_v37 = vld [vmem:[%s3281_s15 + $0xc8] sm:$0xff]  ;;  %v1743_v63 = vadd.f32 %v1711_v27, %v3152_v55  ;;  %v1714_v47 = vld [vmem:[%s3281_s15 + $0xd0] sm:$0xff] }
 0x2fe   : > { %1758 = vst [vmem:[%s3281_s15 + $0x30] sm:$0xff] %v1726_v24  ;;  %v1744_v1 = vadd.f32 %v1712_v38, %v3166_v4  ;;  %v1715_v57 = vld [vmem:[%s3281_s15 + $0xd8] sm:$0xff]  ;;  %v1745_v51 = vadd.f32 %v1713_v37, %v3164_v3  ;;  %v1716_v2 = vld [vmem:[%s3281_s15 + $0xe0] sm:$0xff]  ;;  %v1746_v56 = vadd.f32 %v1714_v47, %v3171_v16  ;;  %v1717_v55 = vld [vmem:[%s3281_s15 + $0xe8] sm:$0xff] }
 0x2ff   : > { %1759 = vst [vmem:[%s3281_s15 + $0x38] sm:$0xff] %v1727_v25  ;;  %v1747_v5 = vadd.f32 %v1715_v57, %v3177_v21  ;;  %v1718_v52 = vld [vmem:[%s3281_s15 + $0xf0] sm:$0xff]  ;;  %v1748_v4 = vadd.f32 %v1716_v2, %v3175_v20  ;;  %v1719_v10 = vld [vmem:[%s3281_s15 + $0xf8] sm:$0xff]  ;;  %v1749_v3 = vadd.f32 %v1717_v55, %v3173_v19 }
 0x300   : > { %1760 = vst [vmem:[%s3281_s15 + $0x40] sm:$0xff] %v1728_v30  ;;  %v1750_v53 = vadd.f32 %v1718_v52, %v3187_v32  ;;  %v1751_v16 = vadd.f32 %v1719_v10, %v3185_v31 }
 0x301   : > { %1761 = vst [vmem:[%s3281_s15 + $0x48] sm:$0xff] %v1729_v33 }
 0x302   : > { %1762 = vst [vmem:[%s3281_s15 + $0x50] sm:$0xff] %v1730_v34 }
 0x303   : > { %1763 = vst [vmem:[%s3281_s15 + $0x58] sm:$0xff] %v1731_v36 }
 0x304   : > { %1764 = vst [vmem:[%s3281_s15 + $0x60] sm:$0xff] %v1732_v39 }
 0x305   : > { %1765 = vst [vmem:[%s3281_s15 + $0x68] sm:$0xff] %v1733_v40 }
 0x306   : > { %1766 = vst [vmem:[%s3281_s15 + $0x70] sm:$0xff] %v1734_v41 }
 0x307   : > { %1767 = vst [vmem:[%s3281_s15 + $0x78] sm:$0xff] %v1735_v42 }
 0x308   : > { %1768 = vst [vmem:[%s3281_s15 + $0x80] sm:$0xff] %v1736_v43 }
 0x309   : > { %1769 = vst [vmem:[%s3281_s15 + $0x88] sm:$0xff] %v1737_v44 }
 0x30a   : > { %1770 = vst [vmem:[%s3281_s15 + $0x90] sm:$0xff] %v1738_v45 }
 0x30b   : > { %1771 = vst [vmem:[%s3281_s15 + $0x98] sm:$0xff] %v1739_v46 }
 0x30c   : > { %1772 = vst [vmem:[%s3281_s15 + $0xa0] sm:$0xff] %v1740_v58 }
 0x30d   : > { %1773 = vst [vmem:[%s3281_s15 + $0xa8] sm:$0xff] %v1741_v59 }
 0x30e   : > { %1774 = vst [vmem:[%s3281_s15 + $0xb0] sm:$0xff] %v1742_v60 }
 0x30f   : > { %1775 = vst [vmem:[%s3281_s15 + $0xb8] sm:$0xff] %v1743_v63 }
 0x310   : > { %1776 = vst [vmem:[%s3281_s15 + $0xc0] sm:$0xff] %v1744_v1 }
 0x311   : > { %1777 = vst [vmem:[%s3281_s15 + $0xc8] sm:$0xff] %v1745_v51 }
 0x312   : > { %1778 = vst [vmem:[%s3281_s15 + $0xd0] sm:$0xff] %v1746_v56 }
 0x313   : > { %1779 = vst [vmem:[%s3281_s15 + $0xd8] sm:$0xff] %v1747_v5 }
 0x314   : > { %1780 = vst [vmem:[%s3281_s15 + $0xe0] sm:$0xff] %v1748_v4 }
 0x315   : > { %1781 = vst [vmem:[%s3281_s15 + $0xe8] sm:$0xff] %v1749_v3 }
 0x316   : > { %1782 = vst [vmem:[%s3281_s15 + $0xf0] sm:$0xff] %v1750_v53 }
 0x317   : > { %1783 = vst [vmem:[%s3281_s15 + $0xf8] sm:$0xff] %v1751_v16 }
 0x318 PF: > { %p2121_p10 = scmp.ne.s32.totalorder %s2709_s19, 2 }
 0x319   : > { %s3381_s29 = scalar_lea.vmem (!%p2121_p10), [#allocation7], %s3074_s17 }
 0x31a   : > { %1787 = sbr.rel (%p2121_p10) target bundleno = 834 (0x342), region = 114 }
 0x31f   : > { %v1789_v19 = vld [vmem:[%s3381_s29] sm:$0xff]  ;;  %v1790_v20 = vld [vmem:[%s3381_s29 + $0x8] sm:$0xff]  ;;  %v1791_v21 = vld [vmem:[%s3381_s29 + $0x10] sm:$0xff] }
 0x320   : > { %v1821_v31 = vmul.f32 0.25, %v1789_v19  ;;  %v1822_v32 = vmul.f32 0.25, %v1790_v20  ;;  %v1823_v11 = vmul.f32 0.25, %v1791_v21  ;;  %v1792_v12 = vld [vmem:[%s3381_s29 + $0x18] sm:$0xff]  ;;  %v1793_v14 = vld [vmem:[%s3381_s29 + $0x20] sm:$0xff]  ;;  %v1794_v15 = vld [vmem:[%s3381_s29 + $0x28] sm:$0xff] }
 0x321   : > { %v1824_v22 = vmul.f32 0.25, %v1792_v12  ;;  %v1795_v23 = vld [vmem:[%s3381_s29 + $0x30] sm:$0xff]  ;;  %v1825_v0 = vmul.f32 0.25, %v1793_v14  ;;  %v1796_v49 = vld [vmem:[%s3381_s29 + $0x38] sm:$0xff]  ;;  %v1826_v54 = vmul.f32 0.25, %v1794_v15  ;;  %v1797_v48 = vld [vmem:[%s3381_s29 + $0x40] sm:$0xff] }
 0x322   : > { %1853 = vst [vmem:[%s3381_s29] sm:$0xff] %v1821_v31  ;;  %v1827_v24 = vmul.f32 0.25, %v1795_v23  ;;  %v1798_v50 = vld [vmem:[%s3381_s29 + $0x48] sm:$0xff]  ;;  %v1828_v25 = vmul.f32 0.25, %v1796_v49  ;;  %v1799_v35 = vld [vmem:[%s3381_s29 + $0x50] sm:$0xff]  ;;  %v1829_v30 = vmul.f32 0.25, %v1797_v48  ;;  %v1800_v13 = vld [vmem:[%s3381_s29 + $0x58] sm:$0xff] }
 0x323   : > { %1854 = vst [vmem:[%s3381_s29 + $0x8] sm:$0xff] %v1822_v32  ;;  %v1830_v33 = vmul.f32 0.25, %v1798_v50  ;;  %v1801_v62 = vld [vmem:[%s3381_s29 + $0x60] sm:$0xff]  ;;  %v1831_v34 = vmul.f32 0.25, %v1799_v35  ;;  %v1802_v61 = vld [vmem:[%s3381_s29 + $0x68] sm:$0xff]  ;;  %v1832_v36 = vmul.f32 0.25, %v1800_v13 }
 0x324   : > { %1855 = vst [vmem:[%s3381_s29 + $0x10] sm:$0xff] %v1823_v11  ;;  %v1803_v6 = vld [vmem:[%s3381_s29 + $0x70] sm:$0xff]  ;;  %v1833_v39 = vmul.f32 0.25, %v1801_v62  ;;  %v1804_v9 = vld [vmem:[%s3381_s29 + $0x78] sm:$0xff]  ;;  %v1834_v40 = vmul.f32 0.25, %v1802_v61  ;;  %v1805_v8 = vld [vmem:[%s3381_s29 + $0x80] sm:$0xff] }
 0x325   : > { %1856 = vst [vmem:[%s3381_s29 + $0x18] sm:$0xff] %v1824_v22  ;;  %v1835_v41 = vmul.f32 0.25, %v1803_v6  ;;  %v1806_v7 = vld [vmem:[%s3381_s29 + $0x88] sm:$0xff]  ;;  %v1836_v42 = vmul.f32 0.25, %v1804_v9  ;;  %v1807_v18 = vld [vmem:[%s3381_s29 + $0x90] sm:$0xff]  ;;  %v1837_v43 = vmul.f32 0.25, %v1805_v8 }
 0x326   : > { %1857 = vst [vmem:[%s3381_s29 + $0x20] sm:$0xff] %v1825_v0  ;;  %v1808_v17 = vld [vmem:[%s3381_s29 + $0x98] sm:$0xff]  ;;  %v1838_v44 = vmul.f32 0.25, %v1806_v7  ;;  %v1809_v26 = vld [vmem:[%s3381_s29 + $0xa0] sm:$0xff]  ;;  %v1839_v45 = vmul.f32 0.25, %v1807_v18  ;;  %v1810_v29 = vld [vmem:[%s3381_s29 + $0xa8] sm:$0xff] }
 0x327   : > { %1858 = vst [vmem:[%s3381_s29 + $0x28] sm:$0xff] %v1826_v54  ;;  %v1840_v46 = vmul.f32 0.25, %v1808_v17  ;;  %v1811_v28 = vld [vmem:[%s3381_s29 + $0xb0] sm:$0xff]  ;;  %v1841_v58 = vmul.f32 0.25, %v1809_v26  ;;  %v1812_v27 = vld [vmem:[%s3381_s29 + $0xb8] sm:$0xff]  ;;  %v1842_v59 = vmul.f32 0.25, %v1810_v29 }
 0x328   : > { %1859 = vst [vmem:[%s3381_s29 + $0x30] sm:$0xff] %v1827_v24  ;;  %v1813_v38 = vld [vmem:[%s3381_s29 + $0xc0] sm:$0xff]  ;;  %v1843_v60 = vmul.f32 0.25, %v1811_v28  ;;  %v1814_v37 = vld [vmem:[%s3381_s29 + $0xc8] sm:$0xff]  ;;  %v1844_v63 = vmul.f32 0.25, %v1812_v27  ;;  %v1815_v47 = vld [vmem:[%s3381_s29 + $0xd0] sm:$0xff] }
 0x329   : > { %1860 = vst [vmem:[%s3381_s29 + $0x38] sm:$0xff] %v1828_v25  ;;  %v1845_v1 = vmul.f32 0.25, %v1813_v38  ;;  %v1816_v57 = vld [vmem:[%s3381_s29 + $0xd8] sm:$0xff]  ;;  %v1846_v51 = vmul.f32 0.25, %v1814_v37  ;;  %v1817_v2 = vld [vmem:[%s3381_s29 + $0xe0] sm:$0xff]  ;;  %v1847_v56 = vmul.f32 0.25, %v1815_v47 }
 0x32a   : > { %1861 = vst [vmem:[%s3381_s29 + $0x40] sm:$0xff] %v1829_v30  ;;  %v1818_v55 = vld [vmem:[%s3381_s29 + $0xe8] sm:$0xff]  ;;  %v1848_v5 = vmul.f32 0.25, %v1816_v57  ;;  %v1819_v52 = vld [vmem:[%s3381_s29 + $0xf0] sm:$0xff]  ;;  %v1849_v4 = vmul.f32 0.25, %v1817_v2  ;;  %v1820_v10 = vld [vmem:[%s3381_s29 + $0xf8] sm:$0xff] }
 0x32b   : > { %1862 = vst [vmem:[%s3381_s29 + $0x48] sm:$0xff] %v1830_v33  ;;  %v1850_v3 = vmul.f32 0.25, %v1818_v55  ;;  %v1851_v53 = vmul.f32 0.25, %v1819_v52  ;;  %v1852_v16 = vmul.f32 0.25, %v1820_v10 }
 0x32c   : > { %1863 = vst [vmem:[%s3381_s29 + $0x50] sm:$0xff] %v1831_v34 }
 0x32d   : > { %1864 = vst [vmem:[%s3381_s29 + $0x58] sm:$0xff] %v1832_v36 }
 0x32e   : > { %1865 = vst [vmem:[%s3381_s29 + $0x60] sm:$0xff] %v1833_v39 }
 0x32f   : > { %1866 = vst [vmem:[%s3381_s29 + $0x68] sm:$0xff] %v1834_v40 }
 0x330   : > { %1867 = vst [vmem:[%s3381_s29 + $0x70] sm:$0xff] %v1835_v41 }
 0x331   : > { %1868 = vst [vmem:[%s3381_s29 + $0x78] sm:$0xff] %v1836_v42 }
 0x332   : > { %1869 = vst [vmem:[%s3381_s29 + $0x80] sm:$0xff] %v1837_v43 }
 0x333   : > { %1870 = vst [vmem:[%s3381_s29 + $0x88] sm:$0xff] %v1838_v44 }
 0x334   : > { %1871 = vst [vmem:[%s3381_s29 + $0x90] sm:$0xff] %v1839_v45 }
 0x335   : > { %1872 = vst [vmem:[%s3381_s29 + $0x98] sm:$0xff] %v1840_v46 }
 0x336   : > { %1873 = vst [vmem:[%s3381_s29 + $0xa0] sm:$0xff] %v1841_v58 }
 0x337   : > { %1874 = vst [vmem:[%s3381_s29 + $0xa8] sm:$0xff] %v1842_v59 }
 0x338   : > { %1875 = vst [vmem:[%s3381_s29 + $0xb0] sm:$0xff] %v1843_v60 }
 0x339   : > { %1876 = vst [vmem:[%s3381_s29 + $0xb8] sm:$0xff] %v1844_v63 }
 0x33a   : > { %1877 = vst [vmem:[%s3381_s29 + $0xc0] sm:$0xff] %v1845_v1 }
 0x33b   : > { %1878 = vst [vmem:[%s3381_s29 + $0xc8] sm:$0xff] %v1846_v51 }
 0x33c   : > { %1879 = vst [vmem:[%s3381_s29 + $0xd0] sm:$0xff] %v1847_v56 }
 0x33d   : > { %1880 = vst [vmem:[%s3381_s29 + $0xd8] sm:$0xff] %v1848_v5 }
 0x33e   : > { %1881 = vst [vmem:[%s3381_s29 + $0xe0] sm:$0xff] %v1849_v4 }
 0x33f   : > { %1882 = vst [vmem:[%s3381_s29 + $0xe8] sm:$0xff] %v1850_v3 }
 0x340   : > { %1883 = vst [vmem:[%s3381_s29 + $0xf0] sm:$0xff] %v1851_v53 }
 0x341   : > { %1884 = vst [vmem:[%s3381_s29 + $0xf8] sm:$0xff] %v1852_v16 }
 0x342 PF: > { %p2534_p11 = scmp.eq.s32.totalorder %s2001_s24, 23  ;;  %s1892_s8 = sshll.u32 %s3483_s4, 4  ;;  %s1893_s8 = int_to_ptr.hbm [resolvable:$true] %s1892_s8 }
 0x343   : > { %s2731_s9 = smov [#allocation7]   ;;  %s2732_s17 = smov 128  }
 0x344   : > { %s1890_s10 = sshll.u32 %s2731_s9, 4  ;;  %s2733_s11 = smov 8   ;;  %s1891_s10 = int_to_ptr.vmem [resolvable:$true] %s1890_s10 }
 0x345   : > { %2531 = dma.vmem_to_hbm [thread:$0]  (%p2534_p11), %s1891_s10, 8192, %s1893_s8, [#allocation8], %s2732_s17, %s2732_s17, %s2733_s11  }
 0x346   : > { %2688 = dma.done.wait (%p2534_p11), [#allocation8], 8192  }
 0x347   : > { %2690 = vsyncadd (%p2534_p11), [#allocation8], 4294959104 }
 0x348 PF: > { %s15_s23 = sadd.s32 1, %s2725_s23   ;;  %s3484_s15 = smov %s2697_s16 }
 0x349   : > { %p12_p12 = scmp.ge.s32.totalorder %s15_s23, 26   ;;  %s3485_s16 = smov %s2825_s6 }
 0x34a   : > { %s3486_s17 = smov %s2713_s20  ;;  %s3487_s18 = smov %s2717_s21 }
 0x34b   : > { %s3488_s19 = smov %s2721_s22  ;;  %s3489_s20 = smov %s3493_s25 }
 0x34c   : > { %s3490_s21 = smov %s3497_s26  ;;  %s3491_s22 = smov %s3501_s27 }
 0x34d   :  { %14 = sbr.rel (!%p12_p12) target bundleno = 5 (0x5), region = 162 }
 0x352   :  { %1909 = vsyncpa [#allocation8], 1 }
 0x353   :  { %1911 = vsyncpa [#allocation8 + $0x1], 1 }

</bundles_post_ra>
